<compile_context>
chip_gen: v7x
topology: tpu7x:2x2x1
jax: 0.10.0
libtpu: 0.0.40
codegen_flags: <defaults>
</compile_context>

<pallas_src>
import functools

import jax
import jax.numpy as jnp
from jax.experimental import pallas as pl
from jax.experimental.pallas import tpu as pltpu

_LANE = 128


def _round_up(x, m):
    return (x + m - 1) // m * m


def _pad2(x, rows, cols):
    return jnp.pad(x, ((0, rows - x.shape[0]), (0, cols - x.shape[1])))


def _vmem_budget_bytes():
    """Generation-aware VMEM budget (leave headroom under the physical cap)."""
    try:
        cap = int(pltpu.get_tpu_info().vmem_capacity_bytes)
        return min(cap * 3 // 4, 96 * 1024 * 1024)
    except Exception:
        return 48 * 1024 * 1024   # safe on v5e/v6e (128 MiB) and v7x (64 MiB)


def _snap_tile(req, n):
    """Largest power-of-two multiple of 128 that is <= min(req, ceil128(n))."""
    cap = min(req, _round_up(n, _LANE))
    t = _LANE
    while t * 2 <= cap:
        t *= 2
    return t


def _fit_tiles_to_vmem(tm, tk, f_in_pad, f_out_pad, budget):
    """Shrink tm/tk (powers of two x 128) until the working set fits."""
    def est(tm_, tk_):
        w_m = max(f_in_pad, f_out_pad)
        return (2 * tm_ * tk_ * 1                     # A int8 (double-buffered)
                + 2 * tk_ * w_m * 2                   # streamed M bf16
                + 2 * tm_ * f_in_pad * 2              # self-path rows bf16
                + 2 * tm_ * 4                         # deg_inv f32
                + 2 * 2 * f_in_pad * f_out_pad * 2    # ws (+wn) bf16
                + 2 * f_out_pad * 4                   # bias f32
                + tm_ * w_m * 4                       # f32 accumulator
                + 2 * tm_ * f_out_pad * 4)            # output
    while est(tm, tk) > budget and (tm > _LANE or tk > _LANE):
        if tk >= tm and tk > _LANE:
            tk //= 2
        else:
            tm //= 2
    return tm, tk


def _block_nnz_table(a_i8, tm, tk):
    """Per row tile: packed list of nonzero k-blocks (trailing entries repeat
    the last valid index so the pipeline dedups their DMA) + a count."""
    n_pad = a_i8.shape[0]
    nbr, nbk = n_pad // tm, n_pad // tk
    blk = (a_i8 != 0).reshape(nbr, tm, nbk, tk).any(axis=(1, 3))   # (nbr, nbk)
    cnt = blk.sum(axis=1).astype(jnp.int32)                        # (nbr,)
    pos = jnp.arange(nbk, dtype=jnp.int32)[None, :]
    key = jnp.where(blk, pos, pos + nbk)          # nonzero blocks sort first
    order = jnp.argsort(key, axis=1).astype(jnp.int32)
    last = jnp.take_along_axis(order, jnp.maximum(cnt - 1, 0)[:, None], axis=1)
    idx = jnp.where(pos < cnt[:, None], order, last)
    return idx.reshape(-1), cnt                   # flat 1-D (SMEM-friendly)


# ---------------------------------------------------------------------------
# Tiny dense projection kernel:  P = X @ W_neigh   (used when f_out < f_in so
# the N^2 aggregation contracts over the smaller width).
# ---------------------------------------------------------------------------
def _project_kernel(x_ref, w_ref, o_ref):
    o_ref[...] = jnp.dot(x_ref[...], w_ref[...],
                         preferred_element_type=jnp.float32).astype(o_ref.dtype)


def _dense_project(x, w, *, tm, vmem_limit):
    n_pad, f_in_pad = x.shape
    f_out_pad = w.shape[1]
    return pl.pallas_call(
        _project_kernel,
        out_shape=jax.ShapeDtypeStruct((n_pad, f_out_pad), jnp.bfloat16),
        grid=(n_pad // tm,),
        in_specs=[
            pl.BlockSpec((tm, f_in_pad), lambda i: (i, 0)),
            pl.BlockSpec((f_in_pad, f_out_pad), lambda i: (0, 0)),
        ],
        out_specs=pl.BlockSpec((tm, f_out_pad), lambda i: (i, 0)),
        compiler_params=pltpu.CompilerParams(
            dimension_semantics=("parallel",),
            vmem_limit_bytes=vmem_limit),
        cost_estimate=pl.CostEstimate(
            flops=2 * n_pad * f_in_pad * f_out_pad,
            transcendentals=0,
            bytes_accessed=2 * n_pad * (f_in_pad + f_out_pad)
                           + 2 * f_in_pad * f_out_pad),
    )(x, w)


# ---------------------------------------------------------------------------
# Fused SAGEConv('mean') layer with K-tiled, block-sparse neighbor aggregation.
#   acc (f32 VMEM)  +=  A_int8[i, blk(k)] (as bf16) @ M[blk(k)]    (nonzero k)
#   at k == last:
#     neigh = acc * (1/deg)
#     project_after:  out = X_blk @ W_self + neigh @ W_neigh + b
#     else         :  out = X_blk @ W_self + neigh            + b   (M = X@Wn)
# ---------------------------------------------------------------------------
def _sage_layer_kernel(idx_ref, cnt_ref, a_ref, m_ref, x_ref, dinv_ref, *rest,
                       apply_relu, project_after):
    if project_after:
        ws_ref, wn_ref, b_ref, o_ref, acc_ref = rest
    else:
        ws_ref, b_ref, o_ref, acc_ref = rest

    i = pl.program_id(0)
    k = pl.program_id(1)

    @pl.when(k == 0)
    def _init():
        acc_ref[...] = jnp.zeros_like(acc_ref)

    # Skip compute on all-zero A tiles; their block index repeats the previous
    # one, so the corresponding DMA was deduped by the pipeline as well.
    @pl.when(k < cnt_ref[i])
    def _accumulate():
        a = a_ref[...].astype(jnp.float32).astype(jnp.bfloat16)   # int8 0/1 -> bf16
        acc_ref[...] += jnp.dot(a, m_ref[...],
                                preferred_element_type=jnp.float32)

    @pl.when(k == pl.num_programs(1) - 1)
    def _epilogue():
        x_blk = x_ref[...]
        neigh = acc_ref[...] * dinv_ref[...]             # mean aggregation, f32
        out = jnp.dot(x_blk, ws_ref[...], preferred_element_type=jnp.float32)
        if project_after:
            # Keep the neighbor term in f32 through its W_neigh matmul.
            out = out + jnp.dot(neigh, wn_ref[...].astype(jnp.float32),
                                preferred_element_type=jnp.float32)
        else:
            out = out + neigh                            # M was already X @ W_neigh
        out = out + b_ref[...]
        if apply_relu:
            out = jnp.maximum(out, 0.0)
        o_ref[...] = out.astype(o_ref.dtype)


def sage_layer(a_i8, blk_idx, blk_cnt, deg_inv, h_pad, w_self, w_neigh, bias,
               *, apply_relu, out_dtype, tm, tk, vmem_limit):
    n_pad = a_i8.shape[0]
    f_in_pad = h_pad.shape[1]
    f_out = w_self.shape[1]
    f_out_pad = _round_up(f_out, _LANE)
    nbr, nbk = n_pad // tm, n_pad // tk

    ws = _pad2(w_self, f_in_pad, f_out_pad).astype(jnp.bfloat16)
    wn = _pad2(w_neigh, f_in_pad, f_out_pad).astype(jnp.bfloat16)
    b = _pad2(bias.reshape(1, -1), 1, f_out_pad).astype(jnp.float32)

    # Stream the narrower matrix through the N^2 aggregation.
    project_after = f_in_pad <= f_out_pad
    if project_after:
        m = h_pad                                      # aggregate raw features
        w_m = f_in_pad
        extra_args = [ws, wn, b]
        extra_specs = [
            pl.BlockSpec(ws.shape, lambda i, k, idx, cnt: (0, 0)),
            pl.BlockSpec(wn.shape, lambda i, k, idx, cnt: (0, 0)),
            pl.BlockSpec((1, f_out_pad), lambda i, k, idx, cnt: (0, 0)),
        ]
    else:
        m = _dense_project(h_pad, wn, tm=tm, vmem_limit=vmem_limit)  # X @ Wn (bf16)
        w_m = f_out_pad
        extra_args = [ws, b]
        extra_specs = [
            pl.BlockSpec(ws.shape, lambda i, k, idx, cnt: (0, 0)),
            pl.BlockSpec((1, f_out_pad), lambda i, k, idx, cnt: (0, 0)),
        ]

    kernel = functools.partial(_sage_layer_kernel, apply_relu=apply_relu,
                               project_after=project_after)

    grid_spec = pltpu.PrefetchScalarGridSpec(
        num_scalar_prefetch=2,
        grid=(nbr, nbk),
        in_specs=[
            # A tile: k-block index read from the prefetched nonzero-block table.
            pl.BlockSpec((tm, tk), lambda i, k, idx, cnt: (i, idx[i * nbk + k])),
            # Streamed M tile follows the same block index.
            pl.BlockSpec((tk, w_m), lambda i, k, idx, cnt: (idx[i * nbk + k], 0)),
            # Self-path rows / per-row 1/deg.
            pl.BlockSpec((tm, f_in_pad), lambda i, k, idx, cnt: (i, 0)),
            pl.BlockSpec((tm, 1), lambda i, k, idx, cnt: (i, 0)),
        ] + extra_specs,
        out_specs=pl.BlockSpec((tm, f_out_pad), lambda i, k, idx, cnt: (i, 0)),
        scratch_shapes=[pltpu.VMEM((tm, w_m), jnp.float32)],
    )

    cost = pl.CostEstimate(
        flops=2 * n_pad * n_pad * w_m + 2 * n_pad * f_in_pad * f_out_pad,
        transcendentals=0,
        bytes_accessed=(n_pad * n_pad                     # int8 A
                        + nbr * n_pad * w_m * 2           # streamed M re-reads
                        + n_pad * f_in_pad * 2            # self-path rows
                        + n_pad * f_out_pad * jnp.dtype(out_dtype).itemsize),
    )

    return pl.pallas_call(
        kernel,
        out_shape=jax.ShapeDtypeStruct((n_pad, f_out_pad), out_dtype),
        grid_spec=grid_spec,
        compiler_params=pltpu.CompilerParams(
            dimension_semantics=("parallel", "arbitrary"),
            vmem_limit_bytes=vmem_limit),
        cost_estimate=cost,
    )(blk_idx, blk_cnt, a_i8, m, h_pad, deg_inv, *extra_args)


def sage_forward(adj, features, params, *, tm=1024, tk=512):
    """SAGE.forward (nlayers=2, mean aggregator, edge_weight=None, eval mode).

    `adj` is the dense (dst, src) adjacency; any nonzero entry is an edge.
    """
    n, f0 = features.shape

    budget = _vmem_budget_bytes()
    f_in_pad = _round_up(f0, _LANE)
    hid_pad = _round_up(params["w_self1"].shape[1], _LANE)
    out_pad = _round_up(params["w_self2"].shape[1], _LANE)

    # Pad N up to the tile instead of shrinking tiles to divide N.
    tm = _snap_tile(tm, n)
    tk = _snap_tile(tk, n)
    tm, tk = _fit_tiles_to_vmem(tm, tk, max(f_in_pad, hid_pad),
                                max(hid_pad, out_pad), budget)
    n_pad = _round_up(n, max(tm, tk))   # tm, tk are powers of two x 128

    adj_f = (adj != 0).astype(jnp.float32)
    deg = adj_f.sum(axis=1, keepdims=True)
    deg_inv = _pad2(1.0 / jnp.maximum(deg, 1.0), n_pad, 1).astype(jnp.float32)

    a_i8 = _pad2(adj_f, n_pad, n_pad).astype(jnp.int8)     # 1-byte 0/1 adjacency
    blk_idx, blk_cnt = _block_nnz_table(a_i8, tm, tk)

    h = _pad2(features, n_pad, f_in_pad).astype(jnp.bfloat16)

    layers = [
        (params["w_self1"], params["w_neigh1"], params["b1"], True),
        (params["w_self2"], params["w_neigh2"], params["b2"], False),
    ]
    for li, (ws, wn, b, relu) in enumerate(layers):
        last = li == len(layers) - 1
        # TODO(synk): nn.Dropout(0.5) between layers is identity in eval mode;
        # training-mode stochastic dropout (pltpu.prng_*) intentionally omitted.
        h = sage_layer(a_i8, blk_idx, blk_cnt, deg_inv, h, ws, wn, b,
                       apply_relu=relu,
                       out_dtype=jnp.float32 if last else jnp.bfloat16,
                       tm=tm, tk=tk, vmem_limit=budget)
    return h[:n, :params["w_self2"].shape[1]]


if __name__ == "__main__":
    N, in_size, hid_size, out_size = 320, 96, 256, 16

    key = jax.random.PRNGKey(0)
    k_feat, k_adj, k1, k2, k3, k4, k5, k6 = jax.random.split(key, 8)

    # Node features.
    x = jax.random.normal(k_feat, (N, in_size), jnp.float32)

    # Deterministic random graph + a ring (every node has >= 1 in-neighbor).
    adj = jax.random.uniform(k_adj, (N, N)) < 0.10
    ring = jnp.roll(jnp.eye(N, dtype=jnp.float32), shift=1, axis=1) > 0
    adj = jnp.logical_or(adj, ring)
    # Carve out an all-zero 256x256 region (dst 0..255 x src 256..) so the
    # block-sparse skip path is actually exercised at tm = tk = 256.
    adj = adj.at[:256, 256:].set(False)
    adj = adj.astype(jnp.float32)

    def glorot(k, shape):
        lim = (6.0 / (shape[0] + shape[1])) ** 0.5
        return jax.random.uniform(k, shape, jnp.float32, -lim, lim)

    params = {
        "w_self1":  glorot(k1, (in_size, hid_size)),
        "w_neigh1": glorot(k2, (in_size, hid_size)),
        "b1":       0.01 * jax.random.normal(k5, (1, hid_size), jnp.float32),
        "w_self2":  glorot(k3, (hid_size, out_size)),
        "w_neigh2": glorot(k4, (hid_size, out_size)),
        "b2":       0.01 * jax.random.normal(k6, (1, out_size), jnp.float32),
    }

    # Small tiles so the run exercises pad-to-tile (320 -> 512), two row blocks
    # on the parallel axis, K accumulation and a skipped all-zero A block.
    out = sage_forward(adj, x, params, tm=256, tk=256)
    out = jax.block_until_ready(out)
    assert out.shape == (N, out_size)

    # Pure-JAX reference mirroring the kernel's quantization points.
    q = lambda t: t.astype(jnp.bfloat16).astype(jnp.float32)
    deg = adj.sum(axis=1, keepdims=True)
    dinv = 1.0 / jnp.maximum(deg, 1.0)

    h0 = q(x)
    # Layer 1 (project_after): neigh term kept in f32 through W_neigh.
    h1 = (h0 @ q(params["w_self1"])
          + ((adj @ h0) * dinv) @ q(params["w_neigh1"]) + params["b1"])
    h1 = q(jnp.maximum(h1, 0.0))
    # Layer 2 (pre-projected): P = X @ W_neigh stored in bf16 before A @ P.
    p2 = q(h1 @ q(params["w_neigh2"]))
    ref = h1 @ q(params["w_self2"]) + (adj @ p2) * dinv + params["b2"]

    max_err = float(jnp.max(jnp.abs(out - ref)))
    assert jnp.allclose(out, ref, atol=2e-2, rtol=2e-2), max_err

    print("KERNEL_OK")
</pallas_src>

<mosaic_0001>
module attributes {stable_mosaic.version = 11 : i64} {
  func.func @_sage_layer_kernel(%arg0: i32, %arg1: i32, %arg2: memref<4xi32, #tpu.memory_space<smem>>, %arg3: memref<2xi32, #tpu.memory_space<smem>>, %arg4: memref<256x256xi8, #tpu.memory_space<vmem>>, %arg5: memref<256x128xbf16, #tpu.memory_space<vmem>>, %arg6: memref<256x128xbf16, #tpu.memory_space<vmem>>, %arg7: memref<256x1xf32, #tpu.memory_space<vmem>>, %arg8: memref<128x256xbf16, #tpu.memory_space<vmem>>, %arg9: memref<128x256xbf16, #tpu.memory_space<vmem>>, %arg10: memref<1x256xf32, #tpu.memory_space<vmem>>, %arg11: memref<256x256xbf16, #tpu.memory_space<vmem>>, %arg12: memref<256x128xf32, #tpu.memory_space<vmem>>) attributes {dimension_semantics = [#tpu.dimension_semantics<parallel>, #tpu.dimension_semantics<arbitrary>], iteration_bounds = array<i64: 2, 2>, scalar_prefetch = 2 : i64, scratch_operands = 1 : i64, tpu.core_type = #tpu.core_type<tc>, window_params = [{transform_indices = @transform_0, window_bounds = array<i64: 256, 256>}, {transform_indices = @transform_1, window_bounds = array<i64: 256, 128>}, {transform_indices = @transform_2, window_bounds = array<i64: 256, 128>}, {transform_indices = @transform_3, window_bounds = array<i64: 256, 1>}, {pipeline_mode = #tpu.pipeline_mode<synchronous>, transform_indices = @transform_4, window_bounds = array<i64: 128, 256>}, {pipeline_mode = #tpu.pipeline_mode<synchronous>, transform_indices = @transform_5, window_bounds = array<i64: 128, 256>}, {pipeline_mode = #tpu.pipeline_mode<synchronous>, transform_indices = @transform_6, window_bounds = array<i64: 1, 256>}, {transform_indices = @transform_7, window_bounds = array<i64: 256, 256>}]} {
    %c0_i32 = arith.constant 0 : i32
    %0 = arith.cmpi eq, %arg1, %c0_i32 : i32
    %1 = arith.extui %0 : i1 to i32
    %c0_i32_0 = arith.constant 0 : i32
    %2 = arith.cmpi ne, %1, %c0_i32_0 : i32
    scf.if %2 {
      %cst = arith.constant 0.000000e+00 : f32
      %11 = vector.broadcast %cst : f32 to vector<256x128xf32>
      %c0 = arith.constant 0 : index
      %c0_3 = arith.constant 0 : index
      %12 = vector.load %arg12[%c0, %c0_3] : memref<256x128xf32, #tpu.memory_space<vmem>>, vector<256x128xf32>
      tpu.vector_store %arg12[%c0, %c0_3], %11 {strides = array<i32>} : memref<256x128xf32, #tpu.memory_space<vmem>>, vector<256x128xf32>,
    } else {
    }
    %3 = arith.index_cast %arg0 : i32 to index
    %4 = memref.load %arg3[%3] : memref<2xi32, #tpu.memory_space<smem>>
    %5 = arith.cmpi slt, %arg1, %4 : i32
    %6 = arith.extui %5 : i1 to i32
    %c0_i32_1 = arith.constant 0 : i32
    %7 = arith.cmpi ne, %6, %c0_i32_1 : i32
    scf.if %7 {
      %c0 = arith.constant 0 : index
      %c0_3 = arith.constant 0 : index
      %11 = vector.load %arg4[%c0, %c0_3] : memref<256x256xi8, #tpu.memory_space<vmem>>, vector<256x256xi8>
      %12 = arith.sitofp %11 : vector<256x256xi8> to vector<256x256xf32>
      %13 = arith.truncf %12 : vector<256x256xf32> to vector<256x256xbf16>
      %c0_4 = arith.constant 0 : index
      %c0_5 = arith.constant 0 : index
      %14 = vector.load %arg12[%c0_4, %c0_5] : memref<256x128xf32, #tpu.memory_space<vmem>>, vector<256x128xf32>
      %c0_6 = arith.constant 0 : index
      %c0_7 = arith.constant 0 : index
      %15 = vector.load %arg5[%c0_6, %c0_7] : memref<256x128xbf16, #tpu.memory_space<vmem>>, vector<256x128xbf16>
      %cst = arith.constant dense<0.000000e+00> : vector<256x128xf32>
      %16 = tpu.matmul %13, %15, %cst {dimension_numbers = #tpu.dot_dimension_numbers<[1], [0], [0], [1], [0, 0, 1, 1], [], []>} : vector<256x256xbf16>, vector<256x128xbf16>, vector<256x128xf32> -> vector<256x128xf32>
      %17 = arith.addf %14, %16 : vector<256x128xf32>
      %c0_8 = arith.constant 0 : index
      %c0_9 = arith.constant 0 : index
      %18 = vector.load %arg12[%c0_8, %c0_9] : memref<256x128xf32, #tpu.memory_space<vmem>>, vector<256x128xf32>
      tpu.vector_store %arg12[%c0_8, %c0_9], %17 {strides = array<i32>} : memref<256x128xf32, #tpu.memory_space<vmem>>, vector<256x128xf32>,
    } else {
    }
    %c1_i32 = arith.constant 1 : i32
    %8 = arith.cmpi eq, %arg1, %c1_i32 : i32
    %9 = arith.extui %8 : i1 to i32
    %c0_i32_2 = arith.constant 0 : i32
    %10 = arith.cmpi ne, %9, %c0_i32_2 : i32
    scf.if %10 {
      %c0 = arith.constant 0 : index
      %c0_3 = arith.constant 0 : index
      %11 = vector.load %arg6[%c0, %c0_3] : memref<256x128xbf16, #tpu.memory_space<vmem>>, vector<256x128xbf16>
      %c0_4 = arith.constant 0 : index
      %c0_5 = arith.constant 0 : index
      %12 = vector.load %arg12[%c0_4, %c0_5] : memref<256x128xf32, #tpu.memory_space<vmem>>, vector<256x128xf32>
      %c0_6 = arith.constant 0 : index
      %c0_7 = arith.constant 0 : index
      %13 = vector.load %arg7[%c0_6, %c0_7] : memref<256x1xf32, #tpu.memory_space<vmem>>, vector<256x1xf32>
      %14 = vector.broadcast %13 : vector<256x1xf32> to vector<256x128xf32>
      %15 = arith.mulf %12, %14 : vector<256x128xf32>
      %c0_8 = arith.constant 0 : index
      %c0_9 = arith.constant 0 : index
      %16 = vector.load %arg8[%c0_8, %c0_9] : memref<128x256xbf16, #tpu.memory_space<vmem>>, vector<128x256xbf16>
      %cst = arith.constant dense<0.000000e+00> : vector<256x256xf32>
      %17 = tpu.matmul %11, %16, %cst {dimension_numbers = #tpu.dot_dimension_numbers<[1], [0], [0], [1], [0, 0, 1, 1], [], []>} : vector<256x128xbf16>, vector<128x256xbf16>, vector<256x256xf32> -> vector<256x256xf32>
      %c0_10 = arith.constant 0 : index
      %c0_11 = arith.constant 0 : index
      %18 = vector.load %arg9[%c0_10, %c0_11] : memref<128x256xbf16, #tpu.memory_space<vmem>>, vector<128x256xbf16>
      %19 = arith.extf %18 : vector<128x256xbf16> to vector<128x256xf32>
      %cst_12 = arith.constant dense<0.000000e+00> : vector<256x256xf32>
      %20 = tpu.matmul %15, %19, %cst_12 {dimension_numbers = #tpu.dot_dimension_numbers<[1], [0], [0], [1], [0, 0, 1, 1], [], []>} : vector<256x128xf32>, vector<128x256xf32>, vector<256x256xf32> -> vector<256x256xf32>
      %21 = arith.addf %17, %20 : vector<256x256xf32>
      %c0_13 = arith.constant 0 : index
      %c0_14 = arith.constant 0 : index
      %22 = vector.load %arg10[%c0_13, %c0_14] : memref<1x256xf32, #tpu.memory_space<vmem>>, vector<1x256xf32>
      %23 = vector.broadcast %22 : vector<1x256xf32> to vector<256x256xf32>
      %24 = arith.addf %21, %23 : vector<256x256xf32>
      %cst_15 = arith.constant 0.000000e+00 : f32
      %25 = vector.broadcast %cst_15 : f32 to vector<256x256xf32>
      %26 = arith.maximumf %24, %25 : vector<256x256xf32>
      %27 = arith.truncf %26 : vector<256x256xf32> to vector<256x256xbf16>
      %c0_16 = arith.constant 0 : index
      %c0_17 = arith.constant 0 : index
      %28 = vector.load %arg11[%c0_16, %c0_17] : memref<256x256xbf16, #tpu.memory_space<vmem>>, vector<256x256xbf16>
      tpu.vector_store %arg11[%c0_16, %c0_17], %27 {strides = array<i32>} : memref<256x256xbf16, #tpu.memory_space<vmem>>, vector<256x256xbf16>,
    } else {
    }
    return
  }
  func.func @transform_0(%arg0: i32, %arg1: i32, %arg2: memref<4xi32, #tpu.memory_space<smem>>, %arg3: memref<2xi32, #tpu.memory_space<smem>>) -> (i32, i32) {
    %c2_i32 = arith.constant 2 : i32
    %0 = arith.muli %arg0, %c2_i32 : i32
    %1 = arith.addi %0, %arg1 : i32
    %2 = arith.index_cast %1 : i32 to index
    %3 = memref.load %arg2[%2] : memref<4xi32, #tpu.memory_space<smem>>
    %c0_i32 = arith.constant 0 : i32
    return %arg0, %3 : i32, i32
  }
  func.func @transform_1(%arg0: i32, %arg1: i32, %arg2: memref<4xi32, #tpu.memory_space<smem>>, %arg3: memref<2xi32, #tpu.memory_space<smem>>) -> (i32, i32) {
    %c2_i32 = arith.constant 2 : i32
    %0 = arith.muli %arg0, %c2_i32 : i32
    %1 = arith.addi %0, %arg1 : i32
    %2 = arith.index_cast %1 : i32 to index
    %3 = memref.load %arg2[%2] : memref<4xi32, #tpu.memory_space<smem>>
    %c0_i32 = arith.constant 0 : i32
    %c0_i32_0 = arith.constant 0 : i32
    return %3, %c0_i32 : i32, i32
  }
  func.func @transform_2(%arg0: i32, %arg1: i32, %arg2: memref<4xi32, #tpu.memory_space<smem>>, %arg3: memref<2xi32, #tpu.memory_space<smem>>) -> (i32, i32) {
    %c0_i32 = arith.constant 0 : i32
    %c0_i32_0 = arith.constant 0 : i32
    return %arg0, %c0_i32 : i32, i32
  }
  func.func @transform_3(%arg0: i32, %arg1: i32, %arg2: memref<4xi32, #tpu.memory_space<smem>>, %arg3: memref<2xi32, #tpu.memory_space<smem>>) -> (i32, i32) {
    %c0_i32 = arith.constant 0 : i32
    %c0_i32_0 = arith.constant 0 : i32
    return %arg0, %c0_i32 : i32, i32
  }
  func.func @transform_4(%arg0: i32, %arg1: i32, %arg2: memref<4xi32, #tpu.memory_space<smem>>, %arg3: memref<2xi32, #tpu.memory_space<smem>>) -> (i32, i32) {
    %c0_i32 = arith.constant 0 : i32
    %c0_i32_0 = arith.constant 0 : i32
    %c0_i32_1 = arith.constant 0 : i32
    return %c0_i32, %c0_i32_0 : i32, i32
  }
  func.func @transform_5(%arg0: i32, %arg1: i32, %arg2: memref<4xi32, #tpu.memory_space<smem>>, %arg3: memref<2xi32, #tpu.memory_space<smem>>) -> (i32, i32) {
    %c0_i32 = arith.constant 0 : i32
    %c0_i32_0 = arith.constant 0 : i32
    %c0_i32_1 = arith.constant 0 : i32
    return %c0_i32, %c0_i32_0 : i32, i32
  }
  func.func @transform_6(%arg0: i32, %arg1: i32, %arg2: memref<4xi32, #tpu.memory_space<smem>>, %arg3: memref<2xi32, #tpu.memory_space<smem>>) -> (i32, i32) {
    %c0_i32 = arith.constant 0 : i32
    %c0_i32_0 = arith.constant 0 : i32
    %c0_i32_1 = arith.constant 0 : i32
    return %c0_i32, %c0_i32_0 : i32, i32
  }
  func.func @transform_7(%arg0: i32, %arg1: i32, %arg2: memref<4xi32, #tpu.memory_space<smem>>, %arg3: memref<2xi32, #tpu.memory_space<smem>>) -> (i32, i32) {
    %c0_i32 = arith.constant 0 : i32
    %c0_i32_0 = arith.constant 0 : i32
    return %arg0, %c0_i32 : i32, i32
  }
}

</mosaic_0001>

<bundles_post_ra>
// kernel: tpu_custom_call.1
= control target key start
LH: loop header
LB: loop body
LE: loop exit
PB: predicated region body
PF: predicated region fallthrough
CT: control target
= control target key end

     0   :  { %s4311_s0 = inlined_call_operand.vmem [shape: s32[4], index: 0, kind: input, shape index: {}]   ;;  %s4312_s2 = inlined_call_operand.vmem [shape: s8[512,512], index: 2, kind: input, shape index: {}]   ;;  %s4313_s3 = inlined_call_operand.hbm [shape: bf16[512,128], index: 3, kind: input, shape index: {}]   ;;  %s4314_s4 = inlined_call_operand.hbm [shape: bf16[512,128], index: 4, kind: input, shape index: {}]   ;;  %s4315_s5 = inlined_call_operand.vmem [shape: f32[512,1], index: 5, kind: input, shape index: {}]   ;;  %s4316_s6 = inlined_call_operand.hbm [shape: bf16[128,256], index: 6, kind: input, shape index: {}]   ;;  %s4317_s7 = inlined_call_operand.hbm [shape: bf16[128,256], index: 7, kind: input, shape index: {}]   ;;  %s4318_s8 = inlined_call_operand.vmem [shape: f32[1,256], index: 8, kind: input, shape index: {}]   ;;  %s4319_s9 = inlined_call_operand.hbm [shape: bf16[512,256], index: 9, kind: output, shape index: {}]   ;;  %s4320_s1 = inlined_call_operand.vmem [shape: s32[2], index: 1, kind: input, shape index: {}]  }
   0x1   :  { %4342 = sst [smem:[#allocation38_spill]] %s4312_s2  ;;  %s14_s11 = sshll.u32 %s4311_s0, 4  ;;  %s15_s11 = int_to_ptr.vmem [resolvable:$true] %s14_s11 }
   0x2   :  { %4343 = sst [smem:[#allocation39_spill]] %s4315_s5  ;;  %s18_s14 = sshll.u32 %s4320_s1, 4  ;;  %s19_s14 = int_to_ptr.vmem [resolvable:$true] %s18_s14 }
   0x3   :  { %4344 = sst [smem:[#allocation40_spill]] %s4318_s8  ;;  %s3076_s15 = scalar_lea.vmem %s15_s11, 16 }
   0x4   :  { %4345 = sst [smem:[#allocation41_spill]] %s4319_s9  ;;  %p3077_p0 = scmp.ne.s32.totalorder %s15_s11, %s3076_s15 }
   0x5   :  { %p3081_p1 = scmp.lt.s32.totalorder %s15_s11, %s15_s11  ;;  %p3082_p2 = scmp.lt.s32.totalorder %s3076_s15, %s3076_s15 }
   0x7   :  { %p3083_p3 = por %p3082_p2, %p3081_p1 }
   0x9   :  { %p3084_p4 = pnand %p3083_p3, %p3077_p0 }
   0xb   :  { %3087 = shalt.err (!%p3084_p4)  }
   0xc   :  { %s3366_s16 = smov [#allocation4]   ;;  %s3088_s17 = scalar_lea.vmem %s19_s14, 16 }
   0xd   :  { %17 = dma.vmem_to_smem %s15_s11, 16, %s3366_s16, [#allocation3] }
   0xe   :  { %p3089_p5 = scmp.ne.s32.totalorder %s19_s14, %s3088_s17  ;;  %p3093_p6 = scmp.lt.s32.totalorder %s19_s14, %s19_s14 }
   0xf   :  { %p3094_p7 = scmp.lt.s32.totalorder %s3088_s17, %s3088_s17 }
  0x11   :  { %p3095_p8 = por %p3094_p7, %p3093_p6 }
  0x13   :  { %p3096_p9 = pnand %p3095_p8, %p3089_p5 }
  0x15   :  { %3099 = shalt.err (!%p3096_p9)  }
  0x16   :  { %s3367_s0 = smov [#allocation5]  }
  0x17   :  { %21 = dma.vmem_to_smem %s19_s14, 16, %s3367_s0, [#allocation3] }
  0x18   :  { %3292 = dma.done.wait [#allocation3], 32 }
  0x19   :  { %3293 = vsyncadd [#allocation3], 4294967264 }
  0x1a   :  { %23 = sfence }
  0x1b   :  { %24 = vsyncpa [#allocation8], 0 }
  0x1c   :  { %26 = vsyncpa [#allocation8 + $0x1], 0 }
  0x1d   :  { %27 = vsyncpa [#allocation11], 0 }
  0x1e   :  { %29 = vsyncpa [#allocation11 + $0x1], 0 }
  0x1f   :  { %30 = vsyncpa [#allocation14], 0 }
  0x20   :  { %31 = vsyncpa [#allocation9], 0 }
  0x21   :  { %33 = vsyncpa [#allocation9 + $0x1], 0  ;;  %s3438_s1 = smov 0   ;;  %s3440_s18 = smov 0  }
  0x22   :  { %s3442_s19 = smov 0   ;;  %s3444_s20 = smov 0  }
  0x23   :  { %s3446_s21 = smov 0   ;;  %s3448_s22 = smov 0  }
  0x24   :  { %s3450_s23 = smov 0   ;;  %s3452_s24 = smov 0  }
  0x25   :  { %s3454_s25 = smov 0   ;;  %s3456_s26 = smov 0  }
  0x26   :  { %s3458_s27 = smov 0   ;;  %s3460_s28 = smov 0  }
  0x27   :  { %s3462_s29 = smov 0  }
  0x28 LB: > { %4346 = sst [smem:[#allocation23_spill]] %s3316_s1  ;;  %s3504_s30 = sadd.s32 4294967295, %s3364_s29   ;;  %s3364_s29 = sphi %s3462_s29, %s39_s29   ;;  %s3360_s28 = sphi %s3460_s28, %s4418_s28   ;;  %s3356_s27 = sphi %s3458_s27, %s4408_s27   ;;  %s3352_s26 = sphi %s3456_s26, %s4417_s26   ;;  %s3348_s25 = sphi %s3454_s25, %s4407_s25   ;;  %s3344_s24 = sphi %s3452_s24, %s4416_s24   ;;  %s3340_s23 = sphi %s3450_s23, %s4415_s23   ;;  %s3336_s22 = sphi %s3448_s22, %s4414_s22   ;;  %s3332_s21 = sphi %s3446_s21, %s4413_s21   ;;  %s3328_s20 = sphi %s3444_s20, %s4404_s20   ;;  %s3324_s19 = sphi %s3442_s19, %s4412_s19   ;;  %s3320_s18 = sphi %s3440_s18, %s4411_s18   ;;  %s3316_s1 = sphi %s3438_s1, %s4410_s1  }
  0x29   : > { %4347 = sst [smem:[#allocation24_spill]] %s3332_s21  ;;  %s48_s11 = sadd.s32 1, %s3356_s27 }
  0x2a   : > { %4348 = sst [smem:[#allocation25_spill]] %s3340_s23  ;;  %s51_s12 = sadd.s32 1, %s3360_s28 }
  0x2b   : > { %4349 = sst [smem:[#allocation26_spill]] %s3348_s25  ;;  %p49_p10 = scmp.ge.s32.totalorder %s48_s11, 2 }
  0x2c   : > { %4350 = sst [smem:[#allocation27_spill]] %s3352_s26  ;;  %s2513_s13 = sshll.u32 %s3360_s28, 1 }
  0x2d   : > { %4351 = sst [smem:[#allocation28_spill]] %s3356_s27  ;;  %s3511_s14 = sadd.s32 %s3356_s27, %s2513_s13 }
  0x2e   : > { %s4420_s11 = smov (%p49_p10, %s48_s11), 0  ;;  %s4422_s12 = smov (!%p49_p10, %s51_s12), %s3360_s28 }
  0x2f   : > { %4352 = sst [smem:[#allocation29_spill]] %s4420_s11  ;;  %p73_p11 = scmp.ne.s32.totalorder %s3344_s24, %s3340_s23 }
  0x30   : > { %s57_s16 = sld [smem:[#allocation4 + %s3511_s14]]  ;;  %p53_p12 = scmp.ge.s32.totalorder %s4422_s12, 2 }
  0x31   : > { %p74_p13 = scmp.eq.s32.totalorder %s3364_s29, 0  ;;  %s91_s17 = sld [smem:[#allocation4 + %s3511_s14]] }
  0x32   : > { %s98_s0 = sadd.s32 1, %s3336_s22  ;;  %s4424_s12 = smov (%p53_p12, %s4422_s12), 0 }
  0x33   : > { %4353 = sst [smem:[#allocation30_spill]] %s4424_s12  ;;  %p3527_p0 = por %p74_p13, %p73_p11 }
  0x34   : > { %p105_p1 = scmp.ne.s32.totalorder %s3336_s22, %s3332_s21  ;;  %s2514_s10 = sshll.u32 %s4424_s12, 1 }
  0x35   : > { %s4354_s13 = scalar_select %p3527_p0, 1, 0 }
  0x36   : > { %s61_s15 = ssub.s32 %s3360_s28, %s4424_s12  ;;  %s59_s27 = sadd.s32 %s2514_s10, %s4420_s11 }
  0x37   : > { %p3539_p2 = por %p105_p1, %p74_p13  ;;  %s60_s8 = sld [smem:[#allocation4 + %s59_s27]] }
  0x38   : > { %s94_s25 = sld [smem:[#allocation4 + %s59_s27]]  ;;  %p111_p3 = scmp.ne.s32.totalorder %s3332_s21, %s3328_s20 }
  0x39   : > { %s4355_s9 = scalar_select %p3539_p2, 1, 0 }
  0x3a   : > { %p4330_p4 = scmp.eq.s32.totalorder %s3504_s30, 0  ;;  %p122_p5 = scmp.eq.s32.totalorder %s61_s15, 0 }
  0x3b   : > { %s124_s12 = sadd.s32 1, %s3324_s19  ;;  %p131_p7 = scmp.ne.s32.totalorder %s3324_s19, %s3320_s18 }
  0x3c   : > { %p3549_p6 = por %p4330_p4, %p111_p3  ;;  %p137_p9 = scmp.ne.s32.totalorder %s3320_s18, %s3316_s1 }
  0x3d   : > { %s3556_s27 = scalar_select %p122_p5, %s3324_s19, %s124_s12  }
  0x3e   : > { %s4356_s10 = scalar_select %p3549_p6, 1, 0 }
  0x3f   : > { %4358 = sst [smem:[#allocation32_spill]] %s3556_s27  ;;  %p3563_p8 = por %p131_p7, %p74_p13 }
  0x40   : > { %4357 = sst [smem:[#allocation31_spill]] %s4356_s10  ;;  %s62_s11 = ssub.s32 %s57_s16, %s60_s8 }
  0x41   : > { %s4359_s20 = scalar_select %p3563_p8, 1, 0 }
  0x42   : > { %s95_s5 = ssub.s32 %s91_s17, %s94_s25  ;;  %s63_s26 = sor.u32 %s62_s11, %s61_s15 }
  0x43   : > { %p96_p10 = scmp.eq.s32.totalorder %s95_s5, 0  ;;  %p64_p11 = scmp.eq.s32.totalorder %s63_s26, 0 }
  0x44   : > { %p3574_p12 = por %p137_p9, %p4330_p4  ;;  %s4363_s10 = sadd.s32 1, %s3344_s24 }
  0x45   : > { %s3579_s27 = scalar_select %p96_p10, %s3336_s22, %s98_s0  }
  0x46   : > { %s4360_s12 = scalar_select %p3574_p12, 1, 0 }
  0x47   : > { %4362 = sst [smem:[#allocation34_spill]] %s3579_s27  ;;  %p250_p13 = scmp.eq.s32.totalorder %s3504_s30, 3 }
  0x48   : > { %4361 = sst [smem:[#allocation33_spill]] %s4360_s12  ;;  %s4365_s23 = sadd.s32 4294967294, %s3364_s29  }
  0x49   : > { %s3584_s21 = scalar_select %p64_p11, %s3344_s24, %s4363_s10  }
  0x4a   : > { %p256_p1 = scmp.eq.s32.totalorder %s4365_s23, 3  ;;  %p2517_p3 = scmp.ge.s32.totalorder %s3364_s29, 1 }
  0x4b   : > { %4364 = sst [smem:[#allocation35_spill]] %s3584_s21  ;;  %p263_p5 = scmp.lt.s32.totalorder %s3364_s29, 5 }
  0x4c   : > { %p3594_p6 = por %p250_p13, %p131_p7  ;;  %p3601_p4 = por %p256_p1, %p137_p9 }
  0x4d   : > { %p3605_p10 = pnand %p2517_p3, %p263_p5  ;;  %s3368_s23 = smov [#allocation12]  }
  0x4e   : > { %s4366_s5 = scalar_select %p3594_p6, 1, 0 }
  0x4f   : > { %s4368_s8 = scalar_select %p3601_p4, 1, 0 }
  0x50   : > { %4367 = sst [smem:[#allocation36_spill]] %s4366_s5  ;;  %p2861_p11 = pneg %p3605_p10 }
  0x51   : > { %4369 = sst [smem:[#allocation37_spill]] %s4368_s8  ;;  %s275_s26 = sshll.u32 %s3368_s23, 4  ;;  %s276_s26 = int_to_ptr.vmem [resolvable:$true] %s275_s26 }
  0x52   : > { %s4370_s25 = scalar_select %p3605_p10, 1, 0 }
  0x53   : > { %p4371_p12 = scmp.eq.s32.totalorder %s3504_s30, 0  ;;  %s3369_s15 = smov [#allocation13]  }
  0x54   : > { %s288_s16 = sshll.u32 %s3369_s15, 4  ;;  %s3100_s10 = scalar_lea.hbm %s4316_s6, 2048  ;;  %s3617_s16 = int_to_ptr.vmem [resolvable:$true] %s288_s16 }
  0x55   : > { %p3613_p7 = pnand %p2861_p11, %p4371_p12  ;;  %p3101_p9 = scmp.ne.s32.totalorder %s4316_s6, %s3100_s10 }
  0x56   : > { %p3107_p3 = scmp.lt.u32.totalorder %s3100_s10, %s4316_s6 }
  0x57   : > { %p3102_p13 = pneg %p3613_p7 }
  0x59   : > { %p3103_p12 = pnand %p3102_p13, %p3101_p9 }
  0x5b   : > { %p3104_p1 = pneg %p3103_p12 }
  0x5d   : > { %p3109_p5 = pnand %p3107_p3, %p3104_p1 }
  0x5f   : > { %3112 = shalt.err (!%p3109_p5)
}
  0x60   : > { %s3113_s15 = scalar_lea.vmem %s276_s26, 2048  ;;  %p3121_p10 = scmp.lt.s32.totalorder %s276_s26, %s276_s26 }
  0x61   : > { %p3114_p11 = scmp.ne.s32.totalorder %s276_s26, %s3113_s15  ;;  %p3122_p8 = scmp.lt.s32.totalorder %s3113_s15, %s3113_s15 }
  0x63   : > { %p3116_p4 = pnand %p3114_p11, %p3102_p13  ;;  %p3123_p2 = por %p3122_p8, %p3121_p10 }
  0x65   : > { %p3117_p6 = pneg %p3116_p4 }
  0x67   : > { %p3124_p0 = pnand %p3123_p2, %p3117_p6 }
  0x69   : > { %3127 = shalt.err (!%p3124_p0)
}
  0x6a   : > { %s3370_s21 = smov 128   ;;  %s3371_s27 = smov 8  }
  0x6b   : > { %2864 = dma.hbm_to_vmem [thread:$0]  (!%p3613_p7), %s4316_s6, 2048, %s276_s26, [#allocation11], %s3370_s21, %s3370_s21, %s3371_s27  }
  0x6c   : > { %s3128_s23 = scalar_lea.hbm %s4317_s7, 2048 }
  0x6d   : > { %p3129_p4 = scmp.ne.s32.totalorder %s4317_s7, %s3128_s23  ;;  %p3135_p6 = scmp.lt.u32.totalorder %s3128_s23, %s4317_s7 }
  0x6f   : > { %p3131_p0 = pnand %p3129_p4, %p3102_p13 }
  0x71   : > { %p3132_p2 = pneg %p3131_p0 }
  0x73   : > { %p3137_p8 = pnand %p3135_p6, %p3132_p2 }
  0x75   : > { %3140 = shalt.err (!%p3137_p8)
}
  0x76   : > { %s3141_s26 = scalar_lea.vmem %s3617_s16, 2048  ;;  %p3149_p1 = scmp.lt.s32.totalorder %s3617_s16, %s3617_s16 }
  0x77   : > { %p3142_p10 = scmp.ne.s32.totalorder %s3617_s16, %s3141_s26  ;;  %p3150_p3 = scmp.lt.s32.totalorder %s3141_s26, %s3141_s26 }
  0x79   : > { %p3144_p9 = pnand %p3142_p10, %p3102_p13  ;;  %p3151_p5 = por %p3150_p3, %p3149_p1 }
  0x7b   : > { %p3145_p12 = pneg %p3144_p9 }
  0x7d   : > { %p3152_p11 = pnand %p3151_p5, %p3145_p12 }
  0x7f   : > { %3155 = shalt.err (!%p3152_p11)
}
  0x80   : > { %2867 = dma.hbm_to_vmem [thread:$0]  (!%p3613_p7), %s4317_s7, 2048, %s3617_s16, [#allocation14], %s3370_s21, %s3370_s21, %s3371_s27  }
  0x81   : > { %p2520_p4 = scmp.ge.s32.totalorder %s3364_s29, 4 }
  0x82   : > { %p4373_p0 = scmp.ne.s32.totalorder (!%p2520_p4), %s4354_s13, 0 }
  0x83   : > { %301 = sbr.rel (%p2520_p4) target bundleno = 214 (0xd6), region = 28 }
  0x8a   : > { %304 = sbr.rel (!%p4373_p0) target bundleno = 157 (0x9d), region = 32  ;;  %s311_s5 = sld [smem:[#allocation4 + %s3511_s14]] (%p4373_p0) }
  0x8b   : > { %s306_s8 = sand.u32 (%p4373_p0), 1, %s3344_s24   ;;  %s2632_s17 = sshll.u32 (%p4373_p0), %s3360_s28, 5 }
  0x8c   : > { %s2521_s0 = sshll.u32 (%p4373_p0), %s306_s8, 7  ;;  %s4374_s2 = sld [smem:[#allocation38_spill]] (%p4373_p0) }
  0x8d   : > { %s308_s13 = scalar_lea.vmem (%p4373_p0), [#allocation6], %s2521_s0 }
  0x90   : > { %s2524_s10 = sshll.u32 (%p4373_p0), %s311_s5, 1 }
  0x91   : > { %s315_s11 = sadd.s32 %s2632_s17, %s2524_s10 }
  0x92   : > { %s2526_s23 = sshll.u32 %s315_s11, 3 }
  0x93   : > { %s3675_s16 = scalar_lea.vmem %s4374_s2, %s2526_s23 }
  0x94   : > { %v330_v0 = vld [vmem:[%s3675_s16] sm:$0xff]  ;;  %v332_v1 = vld [vmem:[%s3675_s16 + $0x8] sm:$0xff] }
  0x95   : > { %v334_v2 = vld [vmem:[%s3675_s16 + $0x20] sm:$0xff]  ;;  %331 = vst [vmem:[%s308_s13] sm:$0xff] %v330_v0  ;;  %333 = vst [vmem:[%s308_s13 + $0x8] sm:$0xff] %v332_v1  ;;  %v336_v3 = vld [vmem:[%s3675_s16 + $0x28] sm:$0xff] }
  0x96   : > { %335 = vst [vmem:[%s308_s13 + $0x10] sm:$0xff] %v334_v2  ;;  %v338_v4 = vld [vmem:[%s3675_s16 + $0x40] sm:$0xff]  ;;  %v340_v5 = vld [vmem:[%s3675_s16 + $0x48] sm:$0xff]  ;;  %337 = vst [vmem:[%s308_s13 + $0x18] sm:$0xff] %v336_v3 }
  0x97   : > { %339 = vst [vmem:[%s308_s13 + $0x20] sm:$0xff] %v338_v4  ;;  %341 = vst [vmem:[%s308_s13 + $0x28] sm:$0xff] %v340_v5  ;;  %v342_v6 = vld [vmem:[%s3675_s16 + $0x60] sm:$0xff]  ;;  %v344_v7 = vld [vmem:[%s3675_s16 + $0x68] sm:$0xff] }
  0x98   : > { %v346_v8 = vld [vmem:[%s3675_s16 + $0x80] sm:$0xff]  ;;  %343 = vst [vmem:[%s308_s13 + $0x30] sm:$0xff] %v342_v6  ;;  %345 = vst [vmem:[%s308_s13 + $0x38] sm:$0xff] %v344_v7  ;;  %v348_v9 = vld [vmem:[%s3675_s16 + $0x88] sm:$0xff] }
  0x99   : > { %347 = vst [vmem:[%s308_s13 + $0x40] sm:$0xff] %v346_v8  ;;  %v350_v10 = vld [vmem:[%s3675_s16 + $0xa0] sm:$0xff]  ;;  %v352_v11 = vld [vmem:[%s3675_s16 + $0xa8] sm:$0xff]  ;;  %349 = vst [vmem:[%s308_s13 + $0x48] sm:$0xff] %v348_v9 }
  0x9a   : > { %351 = vst [vmem:[%s308_s13 + $0x50] sm:$0xff] %v350_v10  ;;  %353 = vst [vmem:[%s308_s13 + $0x58] sm:$0xff] %v352_v11  ;;  %v354_v12 = vld [vmem:[%s3675_s16 + $0xc0] sm:$0xff]  ;;  %v356_v13 = vld [vmem:[%s3675_s16 + $0xc8] sm:$0xff] }
  0x9b   : > { %v358_v14 = vld [vmem:[%s3675_s16 + $0xe0] sm:$0xff]  ;;  %355 = vst [vmem:[%s308_s13 + $0x60] sm:$0xff] %v354_v12  ;;  %357 = vst [vmem:[%s308_s13 + $0x68] sm:$0xff] %v356_v13  ;;  %v360_v15 = vld [vmem:[%s3675_s16 + $0xe8] sm:$0xff] }
  0x9c   : > { %359 = vst [vmem:[%s308_s13 + $0x70] sm:$0xff] %v358_v14  ;;  %361 = vst [vmem:[%s308_s13 + $0x78] sm:$0xff] %v360_v15 }
  0x9d PF: > { %s368_s21 = sand.u32 1, %s3336_s22   ;;  %p4375_p7 = scmp.ne.s32.totalorder %s4355_s9, 0 }
  0x9e   : > { %s2527_s27 = sshll.u32 %s368_s21, 7  ;;  %s392_s17 = sand.u32 1, %s3364_s29  }
  0x9f   : > { %s2849_s1 = scalar_select %p4375_p7, [#allocation4], [#allocation16] }
  0xa0   : > { %s4426_s14 = smov (!%p4375_p7, %s3511_s14), 0  ;;  %s372_s5 = scalar_lea.vmem [#allocation7], %s2527_s27 }
  0xa1   : > { %s375_s12 = sld [smem:[%s2849_s1 + %s4426_s14]]  ;;  %s382_s8 = sshll.u32 %s372_s5, 4  ;;  %s3702_s8 = int_to_ptr.vmem [resolvable:$true] %s382_s8 }
  0xa2   : > { %s394_s0 = sand.u32 1, %s3324_s19   ;;  %s2634_s11 = sshll.u32 %s3360_s28, 11 }
  0xa3   : > { %s2531_s10 = sshll.u32 %s394_s0, 7  ;;  %s3707_s13 = scalar_lea.hbm %s4314_s4, %s2634_s11 }
  0xa4   : > { %s396_s23 = scalar_lea.vmem [#allocation10], %s2531_s10  ;;  %s3716_s5 = scalar_lea.sflag [#allocation8], %s368_s21 }
  0xa5   : > { %s403_s15 = sshll.u32 %s396_s23, 4  ;;  %s3160_s11 = scalar_lea.hbm %s4313_s3, 4096  ;;  %s3709_s15 = int_to_ptr.vmem [resolvable:$true] %s403_s15 }
  0xa7   : > { %s2633_s2 = sshll.u32 %s375_s12, 11 }
  0xa8   : > { %s3714_s1 = scalar_lea.hbm %s4313_s3, %s2633_s2 }
  0xa9   : > { %s3156_s0 = scalar_lea.hbm %s3714_s1, 2048  ;;  %p3161_p8 = scmp.lt.u32.totalorder %s3714_s1, %s4313_s3 }
  0xaa   : > { %p3157_p13 = scmp.ne.s32.totalorder %s3714_s1, %s3156_s0  ;;  %p3162_p10 = scmp.lt.u32.totalorder %s3160_s11, %s3156_s0 }
  0xab   : > { %p3164_p12 = scmp.lt.u32.totalorder %s3156_s0, %s3714_s1 }
  0xac   : > { %p3158_p2 = pnand %p3157_p13, %p4375_p7  ;;  %p3163_p9 = por %p3162_p10, %p3161_p8 }
  0xae   : > { %p3159_p6 = pneg %p3158_p2  ;;  %p3165_p1 = por %p3164_p12, %p3163_p9 }
  0xb0   : > { %p3166_p3 = pnand %p3165_p1, %p3159_p6 }
  0xb2   : > { %3169 = shalt.err (!%p3166_p3)
}
  0xb3   : > { %s3170_s2 = scalar_lea.vmem %s3702_s8, 2048  ;;  %s3372_s21 = smov [#allocation7]  }
  0xb4   : > { %p3171_p5 = scmp.ne.s32.totalorder %s3702_s8, %s3170_s2  ;;  %s3174_s16 = sshll.u32 %s3372_s21, 4  ;;  %s3175_s16 = int_to_ptr.vmem [resolvable:$false] %s3174_s16 }
  0xb5   : > { %s3176_s14 = scalar_lea.vmem %s3175_s16, 4096  ;;  %p3177_p0 = scmp.lt.s32.totalorder %s3702_s8, %s3175_s16 }
  0xb6   : > { %p3172_p11 = pnand %p3171_p5, %p4375_p7  ;;  %p3178_p13 = scmp.lt.s32.totalorder %s3176_s14, %s3170_s2 }
  0xb8   : > { %p3173_p4 = pneg %p3172_p11  ;;  %p3179_p2 = por %p3178_p13, %p3177_p0 }
  0xba   : > { %p3180_p8 = pnand %p3179_p2, %p3173_p4 }
  0xbc   : > { %3183 = shalt.err (!%p3180_p8)
}
  0xbd   : > { %s3373_s27 = smov 64   ;;  %s3374_s0 = smov 4  }
  0xbe   : > { %2851 = dma.hbm_to_vmem [thread:$0]  (%p4375_p7), %s3714_s1, 2048, %s3702_s8, %s3716_s5, %s3373_s27, %s3373_s27, %s3374_s0  }
  0xbf   : > { %s3745_s10 = scalar_lea.sflag [#allocation11], %s392_s17  ;;  %s3184_s12 = scalar_lea.hbm %s3707_s13, 2048 }
  0xc0   : > { %p3185_p6 = scmp.ne.s32.totalorder %s3707_s13, %s3184_s12  ;;  %p4376_p10 = scmp.ne.s32.totalorder %s4359_s20, 0 }
  0xc1   : > { %s3188_s26 = scalar_lea.hbm %s4314_s4, 4096  ;;  %p3189_p1 = scmp.lt.u32.totalorder %s3707_s13, %s4314_s4 }
  0xc2   : > { %p3186_p9 = pnand %p3185_p6, %p4376_p10  ;;  %p3190_p3 = scmp.lt.u32.totalorder %s3188_s26, %s3184_s12 }
  0xc3   : > { %p3192_p11 = scmp.lt.u32.totalorder %s3184_s12, %s3707_s13 }
  0xc4   : > { %p3187_p12 = pneg %p3186_p9  ;;  %p3191_p5 = por %p3190_p3, %p3189_p1 }
  0xc6   : > { %p3193_p7 = por %p3192_p11, %p3191_p5 }
  0xc8   : > { %p3194_p4 = pnand %p3193_p7, %p3187_p12 }
  0xca   : > { %3197 = shalt.err (!%p3194_p4)
}
  0xcb   : > { %s3198_s9 = scalar_lea.vmem %s3709_s15, 2048  ;;  %s3375_s8 = smov [#allocation10]  }
  0xcc   : > { %p3199_p0 = scmp.ne.s32.totalorder %s3709_s15, %s3198_s9  ;;  %s3202_s17 = sshll.u32 %s3375_s8, 4  ;;  %s3203_s17 = int_to_ptr.vmem [resolvable:$false] %s3202_s17 }
  0xcd   : > { %s3204_s1 = scalar_lea.vmem %s3203_s17, 4096  ;;  %p3205_p8 = scmp.lt.s32.totalorder %s3709_s15, %s3203_s17 }
  0xce   : > { %p3200_p13 = pnand %p3199_p0, %p4376_p10  ;;  %p3206_p6 = scmp.lt.s32.totalorder %s3204_s1, %s3198_s9 }
  0xd0   : > { %p3201_p2 = pneg %p3200_p13  ;;  %p3207_p9 = por %p3206_p6, %p3205_p8 }
  0xd2   : > { %p3208_p1 = pnand %p3207_p9, %p3201_p2 }
  0xd4   : > { %3211 = shalt.err (!%p3208_p1)
}
  0xd5   : > { %2852 = dma.hbm_to_vmem [thread:$0]  (%p4376_p10), %s3707_s13, 2048, %s3709_s15, %s3745_s10, %s3373_s27, %s3373_s27, %s3374_s0  }
  0xd6 PF: > { %p4377_p12 = scmp.ne.s32.totalorder %s4370_s25, 0 }
  0xd7   : > { %s4378_s5 = sld [smem:[#allocation25_spill]] (!%p4377_p12)  ;;  %s4380_s14 = sld [smem:[#allocation31_spill]] (!%p4377_p12) }
  0xd8   : > { %424 = sbr.rel (%p4377_p12) target bundleno = 1102 (0x44e), region = 67  ;;  %s4379_s16 = sld [smem:[#allocation24_spill]] (!%p4377_p12) }
  0xdd   : > { %s427_s12 = sand.u32 (!%p4377_p12), 1, %s4378_s5   ;;  %p4381_p3 = scmp.ne.s32.totalorder (!%p4377_p12), %s4380_s14, 0 }
  0xde   : > { %s433_s11 = sand.u32 (!%p4377_p12), 1, %s4379_s16   ;;  %s2535_s23 = sshll.u32 (!%p4377_p12), %s427_s12, 7 }
  0xdf   : > { %s2536_s26 = sshll.u32 %s433_s11, 7  ;;  %s3776_s2 = scalar_lea.vmem [#allocation6], %s2535_s23 }
  0xe0   : > { %s434_s20 = scalar_lea.sflag [#allocation8], %s433_s11  ;;  %s3778_s21 = scalar_lea.vmem [#allocation7], %s2536_s26 }
  0xe1   : > { %3295 = dma.done.wait (%p4381_p3), %s434_s20, 2048  }
  0xe2   : > { %3297 = vsyncadd (%p4381_p3), %s434_s20, 4294965248  ;;  %s4382_s25 = sld [smem:[#allocation33_spill]]  ;;  %s442_s15 = sand.u32 1, %s3504_s30  }
  0xe3   : > { %s3786_s13 = sand.u32 1, %s3320_s18   ;;  %s443_s0 = scalar_lea.sflag [#allocation11], %s442_s15 }
  0xe4   : > { %s2537_s27 = sshll.u32 %s3786_s13, 7 }
  0xe5   : > { %s3789_s10 = scalar_lea.vmem [#allocation10], %s2537_s27 }
  0xe8   : > { %p4383_p10 = scmp.ne.s32.totalorder %s4382_s25, 0 }
  0xea   : > { %3299 = dma.done.wait (%p4383_p10), %s443_s0, 2048  }
  0xeb   : > { %3301 = vsyncadd (%p4383_p10), %s443_s0, 4294965248  ;;  %p4384_p5 = scmp.eq.s32.totalorder %s3504_s30, 0 }
  0xed   : > { %3303 = dma.done.wait (%p4384_p5), [#allocation11], 2048   ;;  %p4385_p11 = pmov %p4384_p5 }
  0xee   : > { %p4386_p7 = pmov %p4384_p5 }
  0xef   : > { %3305 = vsyncadd (%p4385_p11), [#allocation11], 4294965248 }
  0xf0   : > { %3307 = dma.done.wait (%p4386_p7), [#allocation14], 2048   ;;  %p4387_p4 = pmov %p4384_p5 }
  0xf1   : > { %s4388_s9 = sld [smem:[#allocation27_spill]]  ;;  %s2540_s8 = sshll.u32 %s3786_s13, 8 }
  0xf2   : > { %3309 = vsyncadd (%p4387_p4), [#allocation14], 4294965248  ;;  %s4389_s14 = sld [smem:[#allocation39_spill]]  ;;  %s3810_s11 = scalar_lea.vmem [#allocation15], %s2540_s8 }
  0xf3   : > { %s4390_s23 = sld [smem:[#allocation26_spill]] }
  0xf7   : > { %s2541_s17 = sshll.u32 %s4388_s9, 5 }
  0xf8   : > { %p510_p0 = scmp.lt.s32.totalorder %s2541_s17, 63 }
  0xf9   : > { %p2543_p13 = scmp.ne.s32.totalorder %s4390_s23, 0 }
  0xfa   : > { %s4428_s17 = smov (!%p510_p0, %s2541_s17), 63  ;;  %v3376_v16 = vmov (!%p2543_p13), 0.0  }
  0xfb   : > { %s2542_s1 = sshll.u32 %s4428_s17, 3  ;;  %520 = sbr.rel (%p2543_p13) target bundleno = 267 (0x10b), region = 91  ;;  %521 = vst [vmem:[#allocation2] sm:$0xff] (!%p2543_p13), %v3376_v16  ;;  %522 = vst [vmem:[#allocation2 + $0x8] sm:$0xff] (!%p2543_p13), %v3376_v16 }
  0xfc   : > { %s3808_s12 = scalar_lea.vmem %s4389_s14, %s2542_s1  ;;  %523 = vst [vmem:[#allocation2 + $0x10] sm:$0xff] (!%p2543_p13), %v3376_v16  ;;  %524 = vst [vmem:[#allocation2 + $0x18] sm:$0xff] (!%p2543_p13), %v3376_v16 }
  0xfd   : > { %525 = vst [vmem:[#allocation2 + $0x20] sm:$0xff] (!%p2543_p13), %v3376_v16  ;;  %526 = vst [vmem:[#allocation2 + $0x28] sm:$0xff] (!%p2543_p13), %v3376_v16 }
  0xfe   : > { %527 = vst [vmem:[#allocation2 + $0x30] sm:$0xff] (!%p2543_p13), %v3376_v16  ;;  %528 = vst [vmem:[#allocation2 + $0x38] sm:$0xff] (!%p2543_p13), %v3376_v16 }
  0xff   : > { %529 = vst [vmem:[#allocation2 + $0x40] sm:$0xff] (!%p2543_p13), %v3376_v16  ;;  %530 = vst [vmem:[#allocation2 + $0x48] sm:$0xff] (!%p2543_p13), %v3376_v16 }
 0x100   : > { %531 = vst [vmem:[#allocation2 + $0x50] sm:$0xff] (!%p2543_p13), %v3376_v16  ;;  %532 = vst [vmem:[#allocation2 + $0x58] sm:$0xff] (!%p2543_p13), %v3376_v16 }
 0x101   : > { %533 = vst [vmem:[#allocation2 + $0x60] sm:$0xff] (!%p2543_p13), %v3376_v16  ;;  %534 = vst [vmem:[#allocation2 + $0x68] sm:$0xff] (!%p2543_p13), %v3376_v16 }
 0x102   : > { %535 = vst [vmem:[#allocation2 + $0x70] sm:$0xff] %v3376_v16  ;;  %536 = vst [vmem:[#allocation2 + $0x78] sm:$0xff] %v3376_v16 }
 0x103   : > { %537 = vst [vmem:[#allocation2 + $0x80] sm:$0xff] %v3376_v16  ;;  %538 = vst [vmem:[#allocation2 + $0x88] sm:$0xff] %v3376_v16 }
 0x104   : > { %539 = vst [vmem:[#allocation2 + $0x90] sm:$0xff] %v3376_v16  ;;  %540 = vst [vmem:[#allocation2 + $0x98] sm:$0xff] %v3376_v16 }
 0x105   : > { %541 = vst [vmem:[#allocation2 + $0xa0] sm:$0xff] %v3376_v16  ;;  %542 = vst [vmem:[#allocation2 + $0xa8] sm:$0xff] %v3376_v16 }
 0x106   : > { %543 = vst [vmem:[#allocation2 + $0xb0] sm:$0xff] %v3376_v16  ;;  %544 = vst [vmem:[#allocation2 + $0xb8] sm:$0xff] %v3376_v16 }
 0x107   : > { %545 = vst [vmem:[#allocation2 + $0xc0] sm:$0xff] %v3376_v16  ;;  %546 = vst [vmem:[#allocation2 + $0xc8] sm:$0xff] %v3376_v16 }
 0x108   : > { %547 = vst [vmem:[#allocation2 + $0xd0] sm:$0xff] %v3376_v16  ;;  %548 = vst [vmem:[#allocation2 + $0xd8] sm:$0xff] %v3376_v16 }
 0x109   : > { %549 = vst [vmem:[#allocation2 + $0xe0] sm:$0xff] %v3376_v16  ;;  %550 = vst [vmem:[#allocation2 + $0xe8] sm:$0xff] %v3376_v16 }
 0x10a   : > { %551 = vst [vmem:[#allocation2 + $0xf0] sm:$0xff] %v3376_v16  ;;  %552 = vst [vmem:[#allocation2 + $0xf8] sm:$0xff] %v3376_v16 }
 0x10b PF: > { %s4391_s30 = sld [smem:[#allocation27_spill]]  ;;  %s4392_s20 = sld [smem:[#allocation26_spill]] }
 0x111   : > { %s553_s26 = sld [smem:[#allocation5 + %s4391_s30]] }
 0x117   : > { %p2544_p2 = scmp.ge.s32.totalorder %s4392_s20, %s553_s26 }
 0x118   : > { %v2994_v17 = vld [vmem:[%s3778_s21 + $0x40] sm:$0xff] (!%p2544_p2)   ;;  %v2996_v19 = vld [vmem:[%s3778_s21 + $0x48] sm:$0xff] (!%p2544_p2)   ;;  %v2998_v21 = vld [vmem:[%s3778_s21 + $0x50] sm:$0xff] (!%p2544_p2)  }
 0x119   : > { %557 = sbr.rel (%p2544_p2) target bundleno = 589 (0x24d), region = 95  ;;  %v2995_v18 = vld [vmem:[%s3778_s21] sm:$0xff] (!%p2544_p2)   ;;  %2669 = vmatprep.subr.bf16.mxu0 (!%p2544_p2), %v2994_v17  ;;  %2813 = vmatprep.subr.bf16.mxu1 (!%p2544_p2), %v2994_v17  ;;  %v2997_v20 = vld [vmem:[%s3778_s21 + $0x8] sm:$0xff] (!%p2544_p2)   ;;  %v2999_v22 = vld [vmem:[%s3778_s21 + $0x10] sm:$0xff] (!%p2544_p2)  }
 0x11a   : > { %2670 = vmatpush3.bf16.msra.mxu0 (!%p2544_p2), %v2995_v18  ;;  %2821 = vmatpush3.bf16.msra.mxu1 (!%p2544_p2), %v2995_v18  ;;  %v3000_v23 = vld [vmem:[%s3778_s21 + $0x58] sm:$0xff] (!%p2544_p2)   ;;  %v3002_v25 = vld [vmem:[%s3778_s21 + $0x60] sm:$0xff] (!%p2544_p2)   ;;  %v3004_v27 = vld [vmem:[%s3778_s21 + $0x68] sm:$0xff] (!%p2544_p2)  }
 0x11b   : > { %2671 = vmatprep.subr.bf16.mxu0 (!%p2544_p2), %v2996_v19  ;;  %2814 = vmatprep.subr.bf16.mxu1 (!%p2544_p2), %v2996_v19  ;;  %v3001_v24 = vld [vmem:[%s3778_s21 + $0x18] sm:$0xff] (!%p2544_p2)   ;;  %v3003_v26 = vld [vmem:[%s3778_s21 + $0x20] sm:$0xff] (!%p2544_p2)   ;;  %v559_v28 = vld [vmem:[%s3776_s2 + $0x8] sm:$0xff] (!%p2544_p2) }
 0x11c   : > { %v567_v29 = vld [vmem:[%s3776_s2 + $0x48] sm:$0xff] (!%p2544_p2)  ;;  %v575_v30 = vunpack.c.l.s8.bf16 (!%p2544_p2), %v559_v28  ;;  %v3006_v33 = vld [vmem:[%s3778_s21 + $0x70] sm:$0xff] (!%p2544_p2)   ;;  %v3008_v35 = vld [vmem:[%s3778_s21 + $0x78] sm:$0xff] (!%p2544_p2)   ;;  %v577_v41 = vunpack.c.h.s8.bf16 (!%p2544_p2), %v559_v28 }
 0x11d   : > { %v591_v31 = vunpack.c.l.s8.bf16 (!%p2544_p2), %v567_v29  ;;  %v3005_v32 = vld [vmem:[%s3778_s21 + $0x28] sm:$0xff] (!%p2544_p2)   ;;  %v3007_v34 = vld [vmem:[%s3778_s21 + $0x30] sm:$0xff] (!%p2544_p2)   ;;  %v3009_v36 = vld [vmem:[%s3778_s21 + $0x38] sm:$0xff] (!%p2544_p2)   ;;  %v593_v42 = vunpack.c.h.s8.bf16 (!%p2544_p2), %v567_v29 }
 0x11e   : > { %2672 = vmatpush3.bf16.msra.mxu0 (!%p2544_p2), %v2997_v20  ;;  %2822 = vmatpush3.bf16.msra.mxu1 (!%p2544_p2), %v2997_v20  ;;  %v558_v37 = vld [vmem:[%s3776_s2] sm:$0xff] (!%p2544_p2)  ;;  %v561_v43 = vld [vmem:[%s3776_s2 + $0x18] sm:$0xff] (!%p2544_p2)  ;;  %v560_v49 = vld [vmem:[%s3776_s2 + $0x10] sm:$0xff] (!%p2544_p2) }
 0x11f   : > { %2673 = vmatprep.subr.bf16.mxu0 (!%p2544_p2), %v2998_v21  ;;  %2815 = vmatprep.subr.bf16.mxu1 (!%p2544_p2), %v2998_v21  ;;  %v566_v38 = vld [vmem:[%s3776_s2 + $0x40] sm:$0xff] (!%p2544_p2)  ;;  %v574_v39 = vunpack.c.l.s8.bf16 (!%p2544_p2), %v558_v37  ;;  %v569_v44 = vld [vmem:[%s3776_s2 + $0x58] sm:$0xff] (!%p2544_p2)  ;;  %v576_v45 = vunpack.c.h.s8.bf16 (!%p2544_p2), %v558_v37  ;;  %v579_v47 = vunpack.c.l.s8.bf16 (!%p2544_p2), %v561_v43  ;;  %v568_v50 = vld [vmem:[%s3776_s2 + $0x50] sm:$0xff] (!%p2544_p2)  ;;  %v578_v51 = vunpack.c.l.s8.bf16 (!%p2544_p2), %v560_v49 }
 0x120   : > { %798 = vmatprep.mubr.bf16.mxu0 %v575_v30  ;;  %862 = vmatprep.mubr.bf16.mxu1 %v591_v31  ;;  %v590_v40 = vunpack.c.l.s8.bf16 %v566_v38  ;;  %v592_v46 = vunpack.c.h.s8.bf16 %v566_v38  ;;  %v595_v48 = vunpack.c.l.s8.bf16 %v569_v44  ;;  %v594_v52 = vunpack.c.l.s8.bf16 %v568_v50  ;;  %v563_v55 = vld [vmem:[%s3776_s2 + $0x28] sm:$0xff]  ;;  %v562_v61 = vld [vmem:[%s3776_s2 + $0x20] sm:$0xff]  ;;  %v565_v3 = vld [vmem:[%s3776_s2 + $0x38] sm:$0xff] }
 0x121   : > { %v581_v53 = vunpack.c.h.s8.bf16 %v561_v43  ;;  %v597_v54 = vunpack.c.h.s8.bf16 %v569_v44  ;;  %v571_v56 = vld [vmem:[%s3776_s2 + $0x68] sm:$0xff]  ;;  %v580_v57 = vunpack.c.h.s8.bf16 %v560_v49  ;;  %v596_v58 = vunpack.c.h.s8.bf16 %v568_v50  ;;  %v570_v62 = vld [vmem:[%s3776_s2 + $0x60] sm:$0xff]  ;;  %v573_v4 = vld [vmem:[%s3776_s2 + $0x78] sm:$0xff] }
 0x122   : > { %2674 = vmatpush3.bf16.msra.mxu0 %v2999_v22  ;;  %2823 = vmatpush3.bf16.msra.mxu1 %v2999_v22  ;;  %v583_v59 = vunpack.c.l.s8.bf16 %v563_v55  ;;  %v599_v60 = vunpack.c.l.s8.bf16 %v571_v56  ;;  %v582_v63 = vunpack.c.l.s8.bf16 %v562_v61  ;;  %v598_v0 = vunpack.c.l.s8.bf16 %v570_v62  ;;  %v564_v9 = vld [vmem:[%s3776_s2 + $0x30] sm:$0xff]  ;;  %v606_v19 = vld [vmem:[#allocation2] sm:$0xff]  ;;  %v623_v29 = vld [vmem:[#allocation2 + $0x88] sm:$0xff] }
 0x123   : > { %2675 = vmatprep.subr.bf16.mxu0 %v3000_v23  ;;  %2816 = vmatprep.subr.bf16.mxu1 %v3000_v23  ;;  %v585_v1 = vunpack.c.h.s8.bf16 %v563_v55  ;;  %v601_v2 = vunpack.c.h.s8.bf16 %v571_v56  ;;  %v584_v5 = vunpack.c.h.s8.bf16 %v562_v61  ;;  %v600_v6 = vunpack.c.h.s8.bf16 %v570_v62  ;;  %v572_v10 = vld [vmem:[%s3776_s2 + $0x70] sm:$0xff]  ;;  %v622_v21 = vld [vmem:[#allocation2 + $0x80] sm:$0xff]  ;;  %v625_v49 = vld [vmem:[#allocation2 + $0x98] sm:$0xff] }
 0x124   : > { %v587_v7 = vunpack.c.l.s8.bf16 %v565_v3  ;;  %v603_v8 = vunpack.c.l.s8.bf16 %v573_v4  ;;  %v586_v11 = vunpack.c.l.s8.bf16 %v564_v9  ;;  %v602_v12 = vunpack.c.l.s8.bf16 %v572_v10  ;;  %v626_v61 = vld [vmem:[#allocation2 + $0xa0] sm:$0xff] }
 0x125   : > { %v589_v13 = vunpack.c.h.s8.bf16 %v565_v3  ;;  %v605_v14 = vunpack.c.h.s8.bf16 %v573_v4  ;;  %v588_v15 = vunpack.c.h.s8.bf16 %v564_v9  ;;  %v604_v16 = vunpack.c.h.s8.bf16 %v572_v10  ;;  %v611_v3 = vld [vmem:[#allocation2 + $0x28] sm:$0xff] }
 0x126   : > { %2676 = vmatpush3.bf16.msra.mxu0 %v3001_v24  ;;  %2824 = vmatpush3.bf16.msra.mxu1 %v3001_v24 }
 0x127   : > { %2677 = vmatprep.subr.bf16.mxu0 %v3002_v25  ;;  %2817 = vmatprep.subr.bf16.mxu1 %v3002_v25 }
 0x12a   : > { %2678 = vmatpush3.bf16.msra.mxu0 %v3003_v26  ;;  %2825 = vmatpush3.bf16.msra.mxu1 %v3003_v26 }
 0x12b   : > { %2679 = vmatprep.subr.bf16.mxu0 %v3004_v27  ;;  %2818 = vmatprep.subr.bf16.mxu1 %v3004_v27  ;;  %v607_v27 = vld [vmem:[#allocation2 + $0x8] sm:$0xff] }
 0x12e   : > { %2680 = vmatpush3.bf16.msra.mxu0 %v3005_v32  ;;  %2826 = vmatpush3.bf16.msra.mxu1 %v3005_v32 }
 0x12f   : > { %2681 = vmatprep.subr.bf16.mxu0 %v3006_v33  ;;  %2819 = vmatprep.subr.bf16.mxu1 %v3006_v33 }
 0x132   : > { %2682 = vmatpush3.bf16.msra.mxu0 %v3007_v34  ;;  %2827 = vmatpush3.bf16.msra.mxu1 %v3007_v34 }
 0x133   : > { %2683 = vmatprep.subr.bf16.mxu0 %v3008_v35  ;;  %2820 = vmatprep.subr.bf16.mxu1 %v3008_v35 }
 0x136   : > { %2684 = vmatpush3.bf16.msra.mxu0 %v3009_v36  ;;  %2828 = vmatpush3.bf16.msra.mxu1 %v3009_v36 }
 0x139   : > { %799 = vmatmul.mubr.bf16.vlgmr.msra.gmra.mrb[0].mxu0 %v574_v39  ;;  %863 = vmatmul.mubr.bf16.vlgmr.msra.gmra.mrb[0].mxu1 %v590_v40  ;;  %v608_v39 = vld [vmem:[#allocation2 + $0x10] sm:$0xff] }
 0x13a   : > { %806 = vmatprep.mubr.bf16.mxu0 %v577_v41  ;;  %870 = vmatprep.mubr.bf16.mxu1 %v593_v42  ;;  %v624_v41 = vld [vmem:[#allocation2 + $0x90] sm:$0xff] }
 0x141   : > { %807 = vmatmul.mubr.bf16.gmra.mrb[4].mxu0 %v576_v45  ;;  %871 = vmatmul.mubr.bf16.gmra.mrb[4].mxu1 %v592_v46 }
 0x142   : > { %814 = vmatprep.mubr.bf16.mxu0 %v579_v47  ;;  %878 = vmatprep.mubr.bf16.mxu1 %v595_v48  ;;  %v609_v47 = vld [vmem:[#allocation2 + $0x18] sm:$0xff] }
 0x149   : > { %815 = vmatmul.mubr.bf16.gmra.mrb[8].mxu0 %v578_v51  ;;  %879 = vmatmul.mubr.bf16.gmra.mrb[8].mxu1 %v594_v52 }
 0x14a   : > { %822 = vmatprep.mubr.bf16.mxu0 %v581_v53  ;;  %886 = vmatprep.mubr.bf16.mxu1 %v597_v54 }
 0x151   : > { %823 = vmatmul.mubr.bf16.gmra.mrb[12].mxu0 %v580_v57  ;;  %887 = vmatmul.mubr.bf16.gmra.mrb[12].mxu1 %v596_v58 }
 0x152   : > { %830 = vmatprep.mubr.bf16.mxu0 %v583_v59  ;;  %894 = vmatprep.mubr.bf16.mxu1 %v599_v60  ;;  %v610_v59 = vld [vmem:[#allocation2 + $0x20] sm:$0xff] }
 0x159   : > { %831 = vmatmul.mubr.bf16.gmra.mrb[16].mxu0 %v582_v63  ;;  %895 = vmatmul.mubr.bf16.gmra.mrb[16].mxu1 %v598_v0 }
 0x15a   : > { %838 = vmatprep.mubr.bf16.mxu0 %v585_v1  ;;  %902 = vmatprep.mubr.bf16.mxu1 %v601_v2 }
 0x161   : > { %839 = vmatmul.mubr.bf16.gmra.mrb[20].mxu0 %v584_v5  ;;  %903 = vmatmul.mubr.bf16.gmra.mrb[20].mxu1 %v600_v6  ;;  %v627_v5 = vld [vmem:[#allocation2 + $0xa8] sm:$0xff] }
 0x162   : > { %846 = vmatprep.mubr.bf16.mxu0 %v587_v7  ;;  %910 = vmatprep.mubr.bf16.mxu1 %v603_v8 }
 0x169   : > { %847 = vmatmul.mubr.bf16.gmra.mrb[24].mxu0 %v586_v11  ;;  %911 = vmatmul.mubr.bf16.gmra.mrb[24].mxu1 %v602_v12 }
 0x16a   : > { %854 = vmatprep.mubr.bf16.mxu0 %v589_v13  ;;  %918 = vmatprep.mubr.bf16.mxu1 %v605_v14 }
 0x171   : > { %855 = vmatmul.mubr.bf16.gmra.mrb[28].mxu0 %v588_v15  ;;  %919 = vmatmul.mubr.bf16.gmra.mrb[28].mxu1 %v604_v16  ;;  %v612_v15 = vld [vmem:[#allocation2 + $0x30] sm:$0xff] }
 0x20c   : > { %v2685_v17 = vpop.f32.mrb[0].mxu0  ;;  %v2733_v18 = vpop.f32.mrb[0].mxu1 }
 0x20d   : > { %v2686_v20 = vpop.f32.mrb[1].mxu0  ;;  %v2734_v22 = vpop.f32.mrb[1].mxu1 }
 0x20e   : > { %v2687_v23 = vadd.f32 %v2686_v20, %v2685_v17  ;;  %v2735_v24 = vadd.f32 %v2734_v22, %v2733_v18  ;;  %v2688_v25 = vpop.f32.mrb[2].mxu0  ;;  %v2736_v26 = vpop.f32.mrb[2].mxu1  ;;  %v628_v17 = vld [vmem:[#allocation2 + $0xb0] sm:$0xff] }
 0x20f   : > { %v2689_v28 = vpop.f32.mrb[3].mxu0  ;;  %v2737_v30 = vpop.f32.mrb[3].mxu1 }
 0x210   : > { %v927_v31 = vadd.f32 %v2687_v23, %v606_v19  ;;  %v943_v32 = vadd.f32 %v2735_v24, %v622_v21  ;;  %v2690_v33 = vadd.f32 %v2689_v28, %v2688_v25  ;;  %v2738_v34 = vadd.f32 %v2737_v30, %v2736_v26  ;;  %v613_v23 = vld [vmem:[#allocation2 + $0x38] sm:$0xff] }
 0x211   : > { %v629_v25 = vld [vmem:[#allocation2 + $0xb8] sm:$0xff] }
 0x212   : > { %959 = vst [vmem:[#allocation2] sm:$0xff] %v927_v31  ;;  %975 = vst [vmem:[#allocation2 + $0x80] sm:$0xff] %v943_v32  ;;  %v928_v35 = vadd.f32 %v2690_v33, %v607_v27  ;;  %v944_v36 = vadd.f32 %v2738_v34, %v623_v29 }
 0x214   : > { %960 = vst [vmem:[#allocation2 + $0x8] sm:$0xff] %v928_v35  ;;  %976 = vst [vmem:[#allocation2 + $0x88] sm:$0xff] %v944_v36  ;;  %v2691_v37 = vpop.f32.mrb[4].mxu0  ;;  %v2739_v38 = vpop.f32.mrb[4].mxu1  ;;  %v614_v35 = vld [vmem:[#allocation2 + $0x40] sm:$0xff] }
 0x215   : > { %v2692_v40 = vpop.f32.mrb[5].mxu0  ;;  %v2740_v42 = vpop.f32.mrb[5].mxu1 }
 0x216   : > { %v2693_v43 = vadd.f32 %v2692_v40, %v2691_v37  ;;  %v2741_v44 = vadd.f32 %v2740_v42, %v2739_v38  ;;  %v2694_v45 = vpop.f32.mrb[6].mxu0  ;;  %v2742_v46 = vpop.f32.mrb[6].mxu1  ;;  %v630_v37 = vld [vmem:[#allocation2 + $0xc0] sm:$0xff] }
 0x217   : > { %v2695_v48 = vpop.f32.mrb[7].mxu0  ;;  %v2743_v50 = vpop.f32.mrb[7].mxu1 }
 0x218   : > { %v929_v51 = vadd.f32 %v2693_v43, %v608_v39  ;;  %v945_v52 = vadd.f32 %v2741_v44, %v624_v41  ;;  %v2696_v53 = vadd.f32 %v2695_v48, %v2694_v45  ;;  %v2744_v54 = vadd.f32 %v2743_v50, %v2742_v46  ;;  %v615_v43 = vld [vmem:[#allocation2 + $0x48] sm:$0xff] }
 0x219   : > { %v631_v45 = vld [vmem:[#allocation2 + $0xc8] sm:$0xff] }
 0x21a   : > { %961 = vst [vmem:[#allocation2 + $0x10] sm:$0xff] %v929_v51  ;;  %977 = vst [vmem:[#allocation2 + $0x90] sm:$0xff] %v945_v52  ;;  %v930_v55 = vadd.f32 %v2696_v53, %v609_v47  ;;  %v946_v56 = vadd.f32 %v2744_v54, %v625_v49 }
 0x21c   : > { %962 = vst [vmem:[#allocation2 + $0x18] sm:$0xff] %v930_v55  ;;  %978 = vst [vmem:[#allocation2 + $0x98] sm:$0xff] %v946_v56  ;;  %v2697_v57 = vpop.f32.mrb[8].mxu0  ;;  %v2745_v58 = vpop.f32.mrb[8].mxu1  ;;  %v616_v55 = vld [vmem:[#allocation2 + $0x50] sm:$0xff] }
 0x21d   : > { %v2698_v60 = vpop.f32.mrb[9].mxu0  ;;  %v2746_v62 = vpop.f32.mrb[9].mxu1 }
 0x21e   : > { %v2699_v63 = vadd.f32 %v2698_v60, %v2697_v57  ;;  %v2747_v0 = vadd.f32 %v2746_v62, %v2745_v58  ;;  %v2700_v1 = vpop.f32.mrb[10].mxu0  ;;  %v2748_v2 = vpop.f32.mrb[10].mxu1  ;;  %v632_v57 = vld [vmem:[#allocation2 + $0xd0] sm:$0xff] }
 0x21f   : > { %v2701_v4 = vpop.f32.mrb[11].mxu0  ;;  %v2749_v6 = vpop.f32.mrb[11].mxu1 }
 0x220   : > { %v931_v7 = vadd.f32 %v2699_v63, %v610_v59  ;;  %v947_v8 = vadd.f32 %v2747_v0, %v626_v61  ;;  %v2702_v9 = vadd.f32 %v2701_v4, %v2700_v1  ;;  %v2750_v10 = vadd.f32 %v2749_v6, %v2748_v2  ;;  %v617_v63 = vld [vmem:[#allocation2 + $0x58] sm:$0xff] }
 0x221   : > { %v633_v1 = vld [vmem:[#allocation2 + $0xd8] sm:$0xff] }
 0x222   : > { %963 = vst [vmem:[#allocation2 + $0x20] sm:$0xff] %v931_v7  ;;  %979 = vst [vmem:[#allocation2 + $0xa0] sm:$0xff] %v947_v8  ;;  %v932_v11 = vadd.f32 %v2702_v9, %v611_v3  ;;  %v948_v12 = vadd.f32 %v2750_v10, %v627_v5 }
 0x224   : > { %964 = vst [vmem:[#allocation2 + $0x28] sm:$0xff] %v932_v11  ;;  %980 = vst [vmem:[#allocation2 + $0xa8] sm:$0xff] %v948_v12  ;;  %v2703_v13 = vpop.f32.mrb[12].mxu0  ;;  %v2751_v14 = vpop.f32.mrb[12].mxu1  ;;  %v618_v11 = vld [vmem:[#allocation2 + $0x60] sm:$0xff] }
 0x225   : > { %v2704_v16 = vpop.f32.mrb[13].mxu0  ;;  %v2752_v18 = vpop.f32.mrb[13].mxu1 }
 0x226   : > { %v2705_v19 = vadd.f32 %v2704_v16, %v2703_v13  ;;  %v2753_v20 = vadd.f32 %v2752_v18, %v2751_v14  ;;  %v2706_v21 = vpop.f32.mrb[14].mxu0  ;;  %v2754_v22 = vpop.f32.mrb[14].mxu1  ;;  %v634_v13 = vld [vmem:[#allocation2 + $0xe0] sm:$0xff] }
 0x227   : > { %v2707_v24 = vpop.f32.mrb[15].mxu0  ;;  %v2755_v26 = vpop.f32.mrb[15].mxu1 }
 0x228   : > { %v933_v27 = vadd.f32 %v2705_v19, %v612_v15  ;;  %v949_v28 = vadd.f32 %v2753_v20, %v628_v17  ;;  %v2708_v29 = vadd.f32 %v2707_v24, %v2706_v21  ;;  %v2756_v30 = vadd.f32 %v2755_v26, %v2754_v22  ;;  %v619_v19 = vld [vmem:[#allocation2 + $0x68] sm:$0xff] }
 0x229   : > { %v635_v21 = vld [vmem:[#allocation2 + $0xe8] sm:$0xff] }
 0x22a   : > { %965 = vst [vmem:[#allocation2 + $0x30] sm:$0xff] %v933_v27  ;;  %981 = vst [vmem:[#allocation2 + $0xb0] sm:$0xff] %v949_v28  ;;  %v934_v31 = vadd.f32 %v2708_v29, %v613_v23  ;;  %v950_v32 = vadd.f32 %v2756_v30, %v629_v25 }
 0x22c   : > { %966 = vst [vmem:[#allocation2 + $0x38] sm:$0xff] %v934_v31  ;;  %982 = vst [vmem:[#allocation2 + $0xb8] sm:$0xff] %v950_v32  ;;  %v2709_v33 = vpop.f32.mrb[16].mxu0  ;;  %v2757_v34 = vpop.f32.mrb[16].mxu1  ;;  %v620_v31 = vld [vmem:[#allocation2 + $0x70] sm:$0xff] }
 0x22d   : > { %v2710_v36 = vpop.f32.mrb[17].mxu0  ;;  %v2758_v38 = vpop.f32.mrb[17].mxu1 }
 0x22e   : > { %v2711_v39 = vadd.f32 %v2710_v36, %v2709_v33  ;;  %v2759_v40 = vadd.f32 %v2758_v38, %v2757_v34  ;;  %v2712_v41 = vpop.f32.mrb[18].mxu0  ;;  %v2760_v42 = vpop.f32.mrb[18].mxu1  ;;  %v636_v33 = vld [vmem:[#allocation2 + $0xf0] sm:$0xff] }
 0x22f   : > { %v2713_v44 = vpop.f32.mrb[19].mxu0  ;;  %v2761_v46 = vpop.f32.mrb[19].mxu1 }
 0x230   : > { %v935_v47 = vadd.f32 %v2711_v39, %v614_v35  ;;  %v951_v48 = vadd.f32 %v2759_v40, %v630_v37  ;;  %v2714_v49 = vadd.f32 %v2713_v44, %v2712_v41  ;;  %v2762_v50 = vadd.f32 %v2761_v46, %v2760_v42  ;;  %v621_v39 = vld [vmem:[#allocation2 + $0x78] sm:$0xff] }
 0x231   : > { %v637_v41 = vld [vmem:[#allocation2 + $0xf8] sm:$0xff] }
 0x232   : > { %967 = vst [vmem:[#allocation2 + $0x40] sm:$0xff] %v935_v47  ;;  %983 = vst [vmem:[#allocation2 + $0xc0] sm:$0xff] %v951_v48  ;;  %v936_v51 = vadd.f32 %v2714_v49, %v615_v43  ;;  %v952_v52 = vadd.f32 %v2762_v50, %v631_v45 }
 0x234   : > { %968 = vst [vmem:[#allocation2 + $0x48] sm:$0xff] %v936_v51  ;;  %984 = vst [vmem:[#allocation2 + $0xc8] sm:$0xff] %v952_v52  ;;  %v2715_v53 = vpop.f32.mrb[20].mxu0  ;;  %v2763_v54 = vpop.f32.mrb[20].mxu1 }
 0x235   : > { %v2716_v56 = vpop.f32.mrb[21].mxu0  ;;  %v2764_v58 = vpop.f32.mrb[21].mxu1 }
 0x236   : > { %v2717_v59 = vadd.f32 %v2716_v56, %v2715_v53  ;;  %v2765_v60 = vadd.f32 %v2764_v58, %v2763_v54  ;;  %v2718_v61 = vpop.f32.mrb[22].mxu0  ;;  %v2766_v62 = vpop.f32.mrb[22].mxu1 }
 0x237   : > { %v2719_v0 = vpop.f32.mrb[23].mxu0  ;;  %v2767_v2 = vpop.f32.mrb[23].mxu1 }
 0x238   : > { %v937_v3 = vadd.f32 %v2717_v59, %v616_v55  ;;  %v953_v4 = vadd.f32 %v2765_v60, %v632_v57  ;;  %v2720_v5 = vadd.f32 %v2719_v0, %v2718_v61  ;;  %v2768_v6 = vadd.f32 %v2767_v2, %v2766_v62 }
 0x23a   : > { %969 = vst [vmem:[#allocation2 + $0x50] sm:$0xff] %v937_v3  ;;  %985 = vst [vmem:[#allocation2 + $0xd0] sm:$0xff] %v953_v4  ;;  %v938_v7 = vadd.f32 %v2720_v5, %v617_v63  ;;  %v954_v8 = vadd.f32 %v2768_v6, %v633_v1 }
 0x23c   : > { %970 = vst [vmem:[#allocation2 + $0x58] sm:$0xff] %v938_v7  ;;  %986 = vst [vmem:[#allocation2 + $0xd8] sm:$0xff] %v954_v8  ;;  %v2721_v9 = vpop.f32.mrb[24].mxu0  ;;  %v2769_v10 = vpop.f32.mrb[24].mxu1 }
 0x23d   : > { %v2722_v12 = vpop.f32.mrb[25].mxu0  ;;  %v2770_v14 = vpop.f32.mrb[25].mxu1 }
 0x23e   : > { %v2723_v15 = vadd.f32 %v2722_v12, %v2721_v9  ;;  %v2771_v16 = vadd.f32 %v2770_v14, %v2769_v10  ;;  %v2724_v17 = vpop.f32.mrb[26].mxu0  ;;  %v2772_v18 = vpop.f32.mrb[26].mxu1 }
 0x23f   : > { %v2725_v20 = vpop.f32.mrb[27].mxu0  ;;  %v2773_v22 = vpop.f32.mrb[27].mxu1 }
 0x240   : > { %v939_v23 = vadd.f32 %v2723_v15, %v618_v11  ;;  %v955_v24 = vadd.f32 %v2771_v16, %v634_v13  ;;  %v2726_v25 = vadd.f32 %v2725_v20, %v2724_v17  ;;  %v2774_v26 = vadd.f32 %v2773_v22, %v2772_v18 }
 0x242   : > { %971 = vst [vmem:[#allocation2 + $0x60] sm:$0xff] %v939_v23  ;;  %987 = vst [vmem:[#allocation2 + $0xe0] sm:$0xff] %v955_v24  ;;  %v940_v27 = vadd.f32 %v2726_v25, %v619_v19  ;;  %v956_v28 = vadd.f32 %v2774_v26, %v635_v21 }
 0x244   : > { %972 = vst [vmem:[#allocation2 + $0x68] sm:$0xff] %v940_v27  ;;  %988 = vst [vmem:[#allocation2 + $0xe8] sm:$0xff] %v956_v28  ;;  %v2727_v29 = vpop.f32.mrb[28].mxu0  ;;  %v2775_v30 = vpop.f32.mrb[28].mxu1 }
 0x245   : > { %v2728_v32 = vpop.f32.mrb[29].mxu0  ;;  %v2776_v34 = vpop.f32.mrb[29].mxu1 }
 0x246   : > { %v2729_v35 = vadd.f32 %v2728_v32, %v2727_v29  ;;  %v2777_v36 = vadd.f32 %v2776_v34, %v2775_v30  ;;  %v2730_v37 = vpop.f32.mrb[30].mxu0  ;;  %v2778_v38 = vpop.f32.mrb[30].mxu1 }
 0x247   : > { %v2731_v40 = vpop.f32.mrb[31].mxu0  ;;  %v2779_v42 = vpop.f32.mrb[31].mxu1 }
 0x248   : > { %v941_v43 = vadd.f32 %v2729_v35, %v620_v31  ;;  %v957_v44 = vadd.f32 %v2777_v36, %v636_v33  ;;  %v2732_v45 = vadd.f32 %v2731_v40, %v2730_v37  ;;  %v2780_v46 = vadd.f32 %v2779_v42, %v2778_v38 }
 0x24a   : > { %973 = vst [vmem:[#allocation2 + $0x70] sm:$0xff] %v941_v43  ;;  %989 = vst [vmem:[#allocation2 + $0xf0] sm:$0xff] %v957_v44  ;;  %v942_v47 = vadd.f32 %v2732_v45, %v621_v39  ;;  %v958_v48 = vadd.f32 %v2780_v46, %v637_v41 }
 0x24c   : > { %974 = vst [vmem:[#allocation2 + $0x78] sm:$0xff] %v942_v47  ;;  %990 = vst [vmem:[#allocation2 + $0xf8] sm:$0xff] %v958_v48 }
 0x24d PF: > { %s4393_s2 = sld [smem:[#allocation26_spill]] }
 0x253   : > { %p2561_p8 = scmp.ne.s32.totalorder %s4393_s2, 1 }
 0x254   : > { %v1061_v49 = vld [vmem:[%s3808_s12 + $0x10] sm:$0xff] (!%p2561_p8)  ;;  %v1059_v50 = vld [vmem:[%s3808_s12] sm:$0xff] (!%p2561_p8)  ;;  %v3377_v51 = vmov (!%p2561_p8), 0   ;;  %v1062_v52 = vld [vmem:[%s3808_s12 + $0x18] sm:$0xff] (!%p2561_p8)  ;;  %v3378_v54 = vmov (!%p2561_p8), 0.0   ;;  %s4394_s15 = sld [smem:[#allocation40_spill]] (!%p2561_p8) }
 0x255   : > { %994 = sbr.rel (%p2561_p8) target bundleno = 1074 (0x432), region = 99  ;;  %3011 = vset.pattern.permute.xlu1 (!%p2561_p8), %v3377_v51  ;;  %3010 = vset.pattern.permute.xlu0 (!%p2561_p8), %v3377_v51  ;;  %v1060_v53 = vld [vmem:[%s3808_s12 + $0x8] sm:$0xff] (!%p2561_p8)  ;;  %v1063_v56 = vld [vmem:[%s3808_s12 + $0x20] sm:$0xff] (!%p2561_p8)  ;;  %v1066_v57 = vld [vmem:[%s3808_s12 + $0x38] sm:$0xff] (!%p2561_p8) }
 0x256   : > { %1103 = vperm.xlu1 (!%p2561_p8), %3011, %v1061_v49   ;;  %1093 = vperm.xlu0 (!%p2561_p8), %3010, %v1059_v50   ;;  %v1064_v55 = vld [vmem:[%s3808_s12 + $0x28] sm:$0xff] (!%p2561_p8)  ;;  %v1065_v58 = vld [vmem:[%s3808_s12 + $0x30] sm:$0xff] (!%p2561_p8)  ;;  %v1067_v63 = vld [vmem:[%s3808_s12 + $0x40] sm:$0xff] (!%p2561_p8) }
 0x257   : > { %1812 = vmatprep.mubr.bf16.mxu1 (!%p2561_p8), %v3377_v51  ;;  %1411 = vmatprep.mubr.f32.mxu0 (!%p2561_p8), %v3378_v54  ;;  %v3012_v59 = vld [vmem:[#allocation12 + $0x4] ss:$8 sps:$4 sm:$0xff] (!%p2561_p8)   ;;  %v3016_v61 = vld [vmem:[#allocation12] ss:$8 sps:$4 sm:$0xff] (!%p2561_p8)   ;;  %v3018_v1 = vld [vmem:[#allocation12 + $0x14] ss:$8 sps:$4 sm:$0xff] (!%p2561_p8)  }
 0x258   : > { %v3014_v60 = vld [vmem:[#allocation13 + $0x4] ss:$8 sps:$4 sm:$0xff] (!%p2561_p8)   ;;  %1780 = vmatprep.subr.bf16.mxu1 (!%p2561_p8), %v3012_v59  ;;  %v3017_v0 = vld [vmem:[#allocation13] ss:$8 sps:$4 sm:$0xff] (!%p2561_p8)   ;;  %v3020_v2 = vld [vmem:[#allocation13 + $0x14] ss:$8 sps:$4 sm:$0xff] (!%p2561_p8)  }
 0x259   : > { %v1068_v62 = vld [vmem:[%s3808_s12 + $0x48] sm:$0xff] (!%p2561_p8)  ;;  %2782 = vmatprep.subr.bf16.mxu0 (!%p2561_p8), %v3014_v60  ;;  %1781 = vmatpush1.bf16.msra.mxu1 (!%p2561_p8), %v3016_v61  ;;  %v3022_v3 = vld [vmem:[#allocation12 + $0x10] ss:$8 sps:$4 sm:$0xff] (!%p2561_p8)   ;;  %v3030_v11 = vld [vmem:[#allocation12 + $0x34] ss:$8 sps:$4 sm:$0xff] (!%p2561_p8)  }
 0x25a   : > { %1108 = vperm.xlu1 (!%p2561_p8), %3011, %v1062_v52   ;;  %1098 = vperm.xlu0 (!%p2561_p8), %3010, %v1060_v53   ;;  %v3023_v4 = vld [vmem:[#allocation13 + $0x10] ss:$8 sps:$4 sm:$0xff] (!%p2561_p8)   ;;  %v3024_v5 = vld [vmem:[#allocation12 + $0x24] ss:$8 sps:$4 sm:$0xff] (!%p2561_p8)   ;;  %v3028_v9 = vld [vmem:[#allocation12 + $0x20] ss:$8 sps:$4 sm:$0xff] (!%p2561_p8)  }
 0x25b   : > { %2784 = vmatpush1.bf16.msra.mxu0 (!%p2561_p8), %v3017_v0  ;;  %1782 = vmatprep.subr.bf16.mxu1 (!%p2561_p8), %v3018_v1  ;;  %v3026_v6 = vld [vmem:[#allocation13 + $0x24] ss:$8 sps:$4 sm:$0xff] (!%p2561_p8)   ;;  %v1070_v7 = vld [vmem:[%s3808_s12 + $0x58] sm:$0xff] (!%p2561_p8)  ;;  %v1069_v8 = vld [vmem:[%s3808_s12 + $0x50] sm:$0xff] (!%p2561_p8) }
 0x25c   : > { %2786 = vmatprep.subr.bf16.mxu0 %v3020_v2  ;;  %v3029_v10 = vld [vmem:[#allocation13 + $0x20] ss:$8 sps:$4 sm:$0xff]   ;;  %v3032_v12 = vld [vmem:[#allocation13 + $0x34] ss:$8 sps:$4 sm:$0xff]   ;;  %v3034_v15 = vld [vmem:[#allocation12 + $0x30] ss:$8 sps:$4 sm:$0xff]  }
 0x25d   : > { %1783 = vmatpush1.bf16.msra.mxu1 %v3022_v3  ;;  %v1072_v13 = vld [vmem:[%s3808_s12 + $0x68] sm:$0xff]  ;;  %v1071_v14 = vld [vmem:[%s3808_s12 + $0x60] sm:$0xff]  ;;  %v3035_v16 = vld [vmem:[#allocation13 + $0x30] ss:$8 sps:$4 sm:$0xff]  }
 0x25e   : > { %1118 = vperm.xlu1 %3011, %v1064_v55   ;;  %1113 = vperm.xlu0 %3010, %v1063_v56   ;;  %v3036_v17 = vld [vmem:[#allocation12 + $0x44] ss:$8 sps:$4 sm:$0xff]   ;;  %v1074_v19 = vld [vmem:[%s3808_s12 + $0x78] sm:$0xff]  ;;  %v1073_v20 = vld [vmem:[%s3808_s12 + $0x70] sm:$0xff] }
 0x25f   : > { %2788 = vmatpush1.bf16.msra.mxu0 %v3023_v4  ;;  %1784 = vmatprep.subr.bf16.mxu1 %v3024_v5  ;;  %v3038_v18 = vld [vmem:[#allocation13 + $0x44] ss:$8 sps:$4 sm:$0xff]   ;;  %v3040_v21 = vld [vmem:[#allocation12 + $0x40] ss:$8 sps:$4 sm:$0xff]   ;;  %v3042_v23 = vld [vmem:[#allocation12 + $0x54] ss:$8 sps:$4 sm:$0xff]  }
 0x260   : > { %2790 = vmatprep.subr.bf16.mxu0 %v3026_v6  ;;  %v3041_v22 = vld [vmem:[#allocation13 + $0x40] ss:$8 sps:$4 sm:$0xff]   ;;  %v3044_v24 = vld [vmem:[#allocation13 + $0x54] ss:$8 sps:$4 sm:$0xff]   ;;  %v3046_v27 = vld [vmem:[#allocation12 + $0x50] ss:$8 sps:$4 sm:$0xff]  }
 0x261   : > { %1785 = vmatpush1.bf16.msra.mxu1 %v3028_v9  ;;  %v1076_v25 = vld [vmem:[%s3808_s12 + $0x88] sm:$0xff]  ;;  %v1075_v26 = vld [vmem:[%s3808_s12 + $0x80] sm:$0xff]  ;;  %v3047_v28 = vld [vmem:[#allocation13 + $0x50] ss:$8 sps:$4 sm:$0xff]  }
 0x262   : > { %1128 = vperm.xlu1 %3011, %v1066_v57   ;;  %1123 = vperm.xlu0 %3010, %v1065_v58   ;;  %v3048_v29 = vld [vmem:[#allocation12 + $0x64] ss:$8 sps:$4 sm:$0xff]   ;;  %v1078_v31 = vld [vmem:[%s3808_s12 + $0x98] sm:$0xff]  ;;  %v1077_v32 = vld [vmem:[%s3808_s12 + $0x90] sm:$0xff] }
 0x263   : > { %2792 = vmatpush1.bf16.msra.mxu0 %v3029_v10  ;;  %1786 = vmatprep.subr.bf16.mxu1 %v3030_v11  ;;  %v3050_v30 = vld [vmem:[#allocation13 + $0x64] ss:$8 sps:$4 sm:$0xff]   ;;  %v3052_v33 = vld [vmem:[#allocation12 + $0x60] ss:$8 sps:$4 sm:$0xff]   ;;  %v3054_v35 = vld [vmem:[#allocation12 + $0x74] ss:$8 sps:$4 sm:$0xff]  }
 0x264   : > { %2794 = vmatprep.subr.bf16.mxu0 %v3032_v12  ;;  %v3053_v34 = vld [vmem:[#allocation13 + $0x60] ss:$8 sps:$4 sm:$0xff]   ;;  %v3056_v36 = vld [vmem:[#allocation13 + $0x74] ss:$8 sps:$4 sm:$0xff]   ;;  %v3058_v39 = vld [vmem:[#allocation12 + $0x70] ss:$8 sps:$4 sm:$0xff]  }
 0x265   : > { %1787 = vmatpush1.bf16.msra.mxu1 %v3034_v15  ;;  %v1080_v37 = vld [vmem:[%s3808_s12 + $0xa8] sm:$0xff]  ;;  %v1079_v38 = vld [vmem:[%s3808_s12 + $0xa0] sm:$0xff]  ;;  %v3059_v40 = vld [vmem:[#allocation13 + $0x70] ss:$8 sps:$4 sm:$0xff]  }
 0x266   : > { %1138 = vperm.xlu1 %3011, %v1068_v62   ;;  %1133 = vperm.xlu0 %3010, %v1067_v63   ;;  %v1082_v41 = vld [vmem:[%s3808_s12 + $0xb8] sm:$0xff]  ;;  %v1081_v42 = vld [vmem:[%s3808_s12 + $0xb0] sm:$0xff]  ;;  %v3060_v43 = vld [vmem:[%s3789_s10] sm:$0xff]  }
 0x267   : > { %2796 = vmatpush1.bf16.msra.mxu0 %v3035_v16  ;;  %1788 = vmatprep.subr.bf16.mxu1 %v3036_v17  ;;  %v1084_v44 = vld [vmem:[%s3808_s12 + $0xc8] sm:$0xff]  ;;  %v1083_v45 = vld [vmem:[%s3808_s12 + $0xc0] sm:$0xff]  ;;  %v1086_v46 = vld [vmem:[%s3808_s12 + $0xd8] sm:$0xff] }
 0x268   : > { %2798 = vmatprep.subr.bf16.mxu0 %v3038_v18  ;;  %v1085_v47 = vld [vmem:[%s3808_s12 + $0xd0] sm:$0xff]  ;;  %v3061_v48 = vld [vmem:[%s3789_s10 + $0x8] sm:$0xff]   ;;  %v1087_v50 = vld [vmem:[%s3808_s12 + $0xe0] sm:$0xff] }
 0x269   : > { %1789 = vmatpush1.bf16.msra.mxu1 %v3040_v21  ;;  %v1088_v49 = vld [vmem:[%s3808_s12 + $0xe8] sm:$0xff]  ;;  %v1090_v52 = vld [vmem:[%s3808_s12 + $0xf8] sm:$0xff]  ;;  %v1089_v53 = vld [vmem:[%s3808_s12 + $0xf0] sm:$0xff] }
 0x26a   : > { %1148 = vperm.xlu1 %3011, %v1070_v7   ;;  %1143 = vperm.xlu0 %3010, %v1069_v8   ;;  %v3062_v55 = vld [vmem:[%s3789_s10 + $0x10] sm:$0xff]   ;;  %v3063_v56 = vld [vmem:[%s3789_s10 + $0x18] sm:$0xff]   ;;  %v3064_v57 = vld [vmem:[%s3789_s10 + $0x20] sm:$0xff]  }
 0x26b   : > { %2800 = vmatpush1.bf16.msra.mxu0 %v3041_v22  ;;  %1790 = vmatprep.subr.bf16.mxu1 %v3042_v23  ;;  %v3065_v58 = vld [vmem:[%s3789_s10 + $0x28] sm:$0xff]   ;;  %v3066_v59 = vld [vmem:[%s3789_s10 + $0x30] sm:$0xff]   ;;  %v3067_v60 = vld [vmem:[%s3789_s10 + $0x38] sm:$0xff]  }
 0x26c   : > { %2802 = vmatprep.subr.bf16.mxu0 %v3044_v24  ;;  %v3068_v61 = vld [vmem:[%s3789_s10 + $0x40] sm:$0xff]   ;;  %v3069_v62 = vld [vmem:[%s3789_s10 + $0x48] sm:$0xff]   ;;  %v3070_v63 = vld [vmem:[%s3789_s10 + $0x50] sm:$0xff]  }
 0x26d   : > { %1791 = vmatpush1.bf16.msra.mxu1 %v3046_v27  ;;  %v1027_v0 = vld [vmem:[#allocation2] sm:$0xff]  ;;  %v1028_v3 = vld [vmem:[#allocation2 + $0x8] sm:$0xff]  ;;  %v3071_v4 = vld [vmem:[%s3789_s10 + $0x58] sm:$0xff]  }
 0x26e   : > { %1158 = vperm.xlu1 %3011, %v1072_v13   ;;  %1153 = vperm.xlu0 %3010, %v1071_v14   ;;  %v1029_v5 = vld [vmem:[#allocation2 + $0x10] sm:$0xff]  ;;  %v1030_v10 = vld [vmem:[#allocation2 + $0x18] sm:$0xff]  ;;  %v3072_v11 = vld [vmem:[%s3789_s10 + $0x60] sm:$0xff]  }
 0x26f   : > { %2804 = vmatpush1.bf16.msra.mxu0 %v3047_v28  ;;  %1792 = vmatprep.subr.bf16.mxu1 %v3048_v29  ;;  %v1031_v15 = vld [vmem:[#allocation2 + $0x20] sm:$0xff]  ;;  %v1032_v18 = vld [vmem:[#allocation2 + $0x28] sm:$0xff]  ;;  %v1033_v22 = vld [vmem:[#allocation2 + $0x30] sm:$0xff] }
 0x270   : > { %2806 = vmatprep.subr.bf16.mxu0 %v3050_v30  ;;  %v1035_v29 = vld [vmem:[#allocation2 + $0x40] sm:$0xff] }
 0x271   : > { %1793 = vmatpush1.bf16.msra.mxu1 %v3052_v33  ;;  %v3075_v33 = vld [vmem:[%s3789_s10 + $0x78] sm:$0xff]  }
 0x272   : > { %1168 = vperm.xlu1 %3011, %v1074_v19   ;;  %1163 = vperm.xlu0 %3010, %v1073_v20   ;;  %v3073_v19 = vld [vmem:[%s3789_s10 + $0x68] sm:$0xff]  }
 0x273   : > { %2808 = vmatpush1.bf16.msra.mxu0 %v3053_v34  ;;  %1794 = vmatprep.subr.bf16.mxu1 %v3054_v35 }
 0x274   : > { %2810 = vmatprep.subr.bf16.mxu0 %v3056_v36  ;;  %v1037_v36 = vld [vmem:[#allocation2 + $0x50] sm:$0xff] }
 0x275   : > { %1795 = vmatpush1.bf16.msra.mxu1 %v3058_v39  ;;  %v1038_v39 = vld [vmem:[#allocation2 + $0x58] sm:$0xff] }
 0x276   : > { %1178 = vperm.xlu1 %3011, %v1076_v25   ;;  %1173 = vperm.xlu0 %3010, %v1075_v26   ;;  %v1034_v25 = vld [vmem:[#allocation2 + $0x38] sm:$0xff]  ;;  %v3074_v26 = vld [vmem:[%s3789_s10 + $0x70] sm:$0xff]  }
 0x277   : > { %2812 = vmatpush1.bf16.msra.mxu0 %v3059_v40 }
 0x278   : > { %1813 = vmatmul.mubr.bf16.vlgmr.msra.gmra.mrb[0].mxu1 %v3060_v43 }
 0x279   : > { %1822 = vmatprep.mubr.bf16.mxu1 %v3377_v51 }
 0x27a   : > { %1188 = vperm.xlu1 %3011, %v1078_v31   ;;  %1183 = vperm.xlu0 %3010, %v1077_v32   ;;  %v1036_v32 = vld [vmem:[#allocation2 + $0x48] sm:$0xff] }
 0x27e   : > { %1198 = vperm.xlu1 %3011, %v1080_v37   ;;  %1193 = vperm.xlu0 %3010, %v1079_v38  }
 0x280   : > { %1823 = vmatmul.mubr.bf16.gmra.mrb[4].mxu1 %v3061_v48 }
 0x281   : > { %1832 = vmatprep.mubr.bf16.mxu1 %v3377_v51 }
 0x282   : > { %1208 = vperm.xlu1 %3011, %v1082_v41   ;;  %1203 = vperm.xlu0 %3010, %v1081_v42   ;;  %v1039_v41 = vld [vmem:[#allocation2 + $0x60] sm:$0xff] }
 0x286   : > { %1218 = vperm.xlu1 %3011, %v1084_v44   ;;  %1213 = vperm.xlu0 %3010, %v1083_v45   ;;  %v1040_v44 = vld [vmem:[#allocation2 + $0x68] sm:$0xff] }
 0x288   : > { %1833 = vmatmul.mubr.bf16.gmra.mrb[8].mxu1 %v3062_v55  ;;  %v1043_v55 = vld [vmem:[#allocation2 + $0x80] sm:$0xff] }
 0x289   : > { %1842 = vmatprep.mubr.bf16.mxu1 %v3377_v51 }
 0x28a   : > { %1228 = vperm.xlu1 %3011, %v1086_v46   ;;  %1223 = vperm.xlu0 %3010, %v1085_v47   ;;  %v1041_v47 = vld [vmem:[#allocation2 + $0x70] sm:$0xff] }
 0x28e   : > { %1238 = vperm.xlu1 %3011, %v1088_v49   ;;  %1233 = vperm.xlu0 %3010, %v1087_v50   ;;  %v1042_v50 = vld [vmem:[#allocation2 + $0x78] sm:$0xff] }
 0x290   : > { %1843 = vmatmul.mubr.bf16.gmra.mrb[12].mxu1 %v3063_v56 }
 0x291   : > { %1852 = vmatprep.mubr.bf16.mxu1 %v3377_v51 }
 0x292   : > { %1248 = vperm.xlu1 %3011, %v1090_v52   ;;  %1243 = vperm.xlu0 %3010, %v1089_v53  }
 0x298   : > { %1853 = vmatmul.mubr.bf16.gmra.mrb[16].mxu1 %v3064_v57 }
 0x299   : > { %1862 = vmatprep.mubr.bf16.mxu1 %v3377_v51 }
 0x2a0   : > { %1863 = vmatmul.mubr.bf16.gmra.mrb[20].mxu1 %v3065_v58  ;;  %v1044_v58 = vld [vmem:[#allocation2 + $0x88] sm:$0xff] }
 0x2a1   : > { %1872 = vmatprep.mubr.bf16.mxu1 %v3377_v51 }
 0x2a8   : > { %1873 = vmatmul.mubr.bf16.gmra.mrb[24].mxu1 %v3066_v59 }
 0x2a9   : > { %1882 = vmatprep.mubr.bf16.mxu1 %v3377_v51 }
 0x2b0   : > { %1883 = vmatmul.mubr.bf16.gmra.mrb[28].mxu1 %v3067_v60 }
 0x2b1   : > { %1892 = vmatprep.mubr.bf16.mxu1 %v3377_v51 }
 0x2b8   : > { %1893 = vmatmul.mubr.bf16.gmra.mrb[32].mxu1 %v3068_v61  ;;  %v1045_v61 = vld [vmem:[#allocation2 + $0x90] sm:$0xff] }
 0x2b9   : > { %1902 = vmatprep.mubr.bf16.mxu1 %v3377_v51 }
 0x2c0   : > { %1903 = vmatmul.mubr.bf16.gmra.mrb[36].mxu1 %v3069_v62 }
 0x2c1   : > { %1912 = vmatprep.mubr.bf16.mxu1 %v3377_v51 }
 0x2c8   : > { %1913 = vmatmul.mubr.bf16.gmra.mrb[40].mxu1 %v3070_v63 }
 0x2c9   : > { %1922 = vmatprep.mubr.bf16.mxu1 %v3377_v51 }
 0x2d0   : > { %1923 = vmatmul.mubr.bf16.gmra.mrb[44].mxu1 %v3071_v4 }
 0x2d1   : > { %1932 = vmatprep.mubr.bf16.mxu1 %v3377_v51 }
 0x2d5   : > { %v1094_v1 = vpop.permute.xlu0 %1093  ;;  %v1104_v8 = vpop.permute.xlu1 %1103 }
 0x2d6   : > { %v1251_v2 = vmul.f32 %v1094_v1, %v1027_v0  ;;  %v1253_v9 = vmul.f32 %v1104_v8, %v1029_v5  ;;  %v1046_v0 = vld [vmem:[#allocation2 + $0x98] sm:$0xff] }
 0x2d8   : > { %1412 = vmatmul.mubr.f32.vlgmr.msra.gmra.mrb[0].mxu0 %v1251_v2  ;;  %1933 = vmatmul.mubr.bf16.gmra.mrb[48].mxu1 %v3072_v11 }
 0x2d9   : > { %v1099_v6 = vpop.permute.xlu0 %1098  ;;  %1417 = vmatprep.mubr.f32.mxu0 %v3378_v54  ;;  %v1109_v12 = vpop.permute.xlu1 %1108  ;;  %1942 = vmatprep.mubr.bf16.mxu1 %v3377_v51 }
 0x2da   : > { %v1252_v7 = vmul.f32 %v1099_v6, %v1028_v3  ;;  %v1254_v13 = vmul.f32 %v1109_v12, %v1030_v10  ;;  %v1047_v3 = vld [vmem:[#allocation2 + $0xa0] sm:$0xff]  ;;  %v1048_v6 = vld [vmem:[#allocation2 + $0xa8] sm:$0xff]  ;;  %v1050_v12 = vld [vmem:[#allocation2 + $0xb8] sm:$0xff] }
 0x2dc   : > { %1418 = vmatmul.mubr.f32.gmra.mrb[2].mxu0 %v1252_v7 }
 0x2dd   : > { %1423 = vmatprep.mubr.f32.mxu0 %v3378_v54  ;;  %v1114_v14 = vpop.permute.xlu0 %1113  ;;  %v1119_v17 = vpop.permute.xlu1 %1118 }
 0x2de   : > { %v1255_v16 = vmul.f32 %v1114_v14, %v1031_v15  ;;  %v1256_v20 = vmul.f32 %v1119_v17, %v1032_v18  ;;  %v1051_v15 = vld [vmem:[#allocation2 + $0xc0] sm:$0xff]  ;;  %v1052_v18 = vld [vmem:[#allocation2 + $0xc8] sm:$0xff] }
 0x2e0   : > { %1424 = vmatmul.mubr.f32.gmra.mrb[4].mxu0 %v1253_v9  ;;  %1943 = vmatmul.mubr.bf16.gmra.mrb[52].mxu1 %v3073_v19  ;;  %v1049_v9 = vld [vmem:[#allocation2 + $0xb0] sm:$0xff] }
 0x2e1   : > { %1429 = vmatprep.mubr.f32.mxu0 %v3378_v54  ;;  %v1124_v21 = vpop.permute.xlu0 %1123  ;;  %1952 = vmatprep.mubr.bf16.mxu1 %v3377_v51  ;;  %v1129_v24 = vpop.permute.xlu1 %1128 }
 0x2e2   : > { %v1257_v23 = vmul.f32 %v1124_v21, %v1033_v22  ;;  %v1258_v27 = vmul.f32 %v1129_v24, %v1034_v25  ;;  %v1053_v21 = vld [vmem:[#allocation2 + $0xd0] sm:$0xff]  ;;  %v1054_v24 = vld [vmem:[#allocation2 + $0xd8] sm:$0xff] }
 0x2e4   : > { %1430 = vmatmul.mubr.f32.gmra.mrb[6].mxu0 %v1254_v13 }
 0x2e5   : > { %1435 = vmatprep.mubr.f32.mxu0 %v3378_v54  ;;  %v1134_v28 = vpop.permute.xlu0 %1133  ;;  %v1139_v31 = vpop.permute.xlu1 %1138 }
 0x2e6   : > { %v1259_v30 = vmul.f32 %v1134_v28, %v1035_v29  ;;  %v1260_v34 = vmul.f32 %v1139_v31, %v1036_v32 }
 0x2e8   : > { %1436 = vmatmul.mubr.f32.gmra.mrb[8].mxu0 %v1255_v16  ;;  %1953 = vmatmul.mubr.bf16.gmra.mrb[56].mxu1 %v3074_v26 }
 0x2e9   : > { %1441 = vmatprep.mubr.f32.mxu0 %v3378_v54  ;;  %1962 = vmatprep.mubr.bf16.mxu1 %v3377_v51  ;;  %v1144_v35 = vpop.permute.xlu0 %1143  ;;  %v1149_v38 = vpop.permute.xlu1 %1148 }
 0x2ea   : > { %v1261_v37 = vmul.f32 %v1144_v35, %v1037_v36  ;;  %v1262_v51 = vmul.f32 %v1149_v38, %v1038_v39  ;;  %v1058_v36 = vld [vmem:[#allocation2 + $0xf8] sm:$0xff] }
 0x2ec   : > { %1442 = vmatmul.mubr.f32.gmra.mrb[10].mxu0 %v1256_v20 }
 0x2ed   : > { %1447 = vmatprep.mubr.f32.mxu0 %v3378_v54  ;;  %v1154_v40 = vpop.permute.xlu0 %1153  ;;  %v1159_v43 = vpop.permute.xlu1 %1158 }
 0x2ee   : > { %v1263_v42 = vmul.f32 %v1154_v40, %v1039_v41  ;;  %v1264_v45 = vmul.f32 %v1159_v43, %v1040_v44 }
 0x2f0   : > { %1448 = vmatmul.mubr.f32.gmra.mrb[12].mxu0 %v1257_v23  ;;  %1963 = vmatmul.mubr.bf16.gmra.mrb[60].mxu1 %v3075_v33  ;;  %v1057_v33 = vld [vmem:[#allocation2 + $0xf0] sm:$0xff] }
 0x2f1   : > { %1453 = vmatprep.mubr.f32.mxu0 %v3378_v54  ;;  %v1164_v46 = vpop.permute.xlu0 %1163  ;;  %v1169_v49 = vpop.permute.xlu1 %1168 }
 0x2f2   : > { %v1265_v48 = vmul.f32 %v1164_v46, %v1041_v47  ;;  %v1266_v52 = vmul.f32 %v1169_v49, %v1042_v50 }
 0x2f4   : > { %1454 = vmatmul.mubr.f32.gmra.mrb[14].mxu0 %v1258_v27  ;;  %v1055_v27 = vld [vmem:[#allocation2 + $0xe0] sm:$0xff] }
 0x2f5   : > { %1459 = vmatprep.mubr.f32.mxu0 %v3378_v54  ;;  %v1174_v53 = vpop.permute.xlu0 %1173  ;;  %v1179_v57 = vpop.permute.xlu1 %1178 }
 0x2f6   : > { %v1267_v56 = vmul.f32 %v1174_v53, %v1043_v55  ;;  %v1268_v59 = vmul.f32 %v1179_v57, %v1044_v58 }
 0x2f8   : > { %1460 = vmatmul.mubr.f32.gmra.mrb[16].mxu0 %v1259_v30  ;;  %v1056_v30 = vld [vmem:[#allocation2 + $0xe8] sm:$0xff] }
 0x2f9   : > { %1465 = vmatprep.mubr.f32.mxu0 %v3378_v54  ;;  %v1184_v60 = vpop.permute.xlu0 %1183  ;;  %v1189_v63 = vpop.permute.xlu1 %1188 }
 0x2fa   : > { %v1269_v62 = vmul.f32 %v1184_v60, %v1045_v61  ;;  %v1270_v1 = vmul.f32 %v1189_v63, %v1046_v0 }
 0x2fc   : > { %1466 = vmatmul.mubr.f32.gmra.mrb[18].mxu0 %v1260_v34 }
 0x2fd   : > { %1471 = vmatprep.mubr.f32.mxu0 %v3378_v54  ;;  %v1194_v2 = vpop.permute.xlu0 %1193  ;;  %v1199_v5 = vpop.permute.xlu1 %1198 }
 0x2fe   : > { %v1271_v4 = vmul.f32 %v1194_v2, %v1047_v3  ;;  %v1272_v7 = vmul.f32 %v1199_v5, %v1048_v6 }
 0x300   : > { %1472 = vmatmul.mubr.f32.gmra.mrb[20].mxu0 %v1261_v37 }
 0x301   : > { %1477 = vmatprep.mubr.f32.mxu0 %v3378_v54  ;;  %v1204_v8 = vpop.permute.xlu0 %1203  ;;  %v1209_v11 = vpop.permute.xlu1 %1208 }
 0x302   : > { %v1273_v10 = vmul.f32 %v1204_v8, %v1049_v9  ;;  %v1274_v13 = vmul.f32 %v1209_v11, %v1050_v12 }
 0x304   : > { %1478 = vmatmul.mubr.f32.gmra.mrb[22].mxu0 %v1262_v51 }
 0x305   : > { %1483 = vmatprep.mubr.f32.mxu0 %v3378_v54  ;;  %v1214_v14 = vpop.permute.xlu0 %1213  ;;  %v1219_v17 = vpop.permute.xlu1 %1218 }
 0x306   : > { %v1275_v16 = vmul.f32 %v1214_v14, %v1051_v15  ;;  %v1276_v19 = vmul.f32 %v1219_v17, %v1052_v18  ;;  %v1973_v18 = vld [vmem:[%s4394_s15] sm:$0x3] }
 0x308   : > { %1484 = vmatmul.mubr.f32.gmra.mrb[24].mxu0 %v1263_v42 }
 0x309   : > { %1489 = vmatprep.mubr.f32.mxu0 %v3378_v54  ;;  %v1224_v20 = vpop.permute.xlu0 %1223  ;;  %v1229_v23 = vpop.permute.xlu1 %1228 }
 0x30a   : > { %v1277_v22 = vmul.f32 %v1224_v20, %v1053_v21  ;;  %v1278_v25 = vmul.f32 %v1229_v23, %v1054_v24 }
 0x30c   : > { %1490 = vmatmul.mubr.f32.gmra.mrb[26].mxu0 %v1264_v45 }
 0x30d   : > { %1495 = vmatprep.mubr.f32.mxu0 %v3378_v54  ;;  %v1234_v26 = vpop.permute.xlu0 %1233  ;;  %v1239_v29 = vpop.permute.xlu1 %1238 }
 0x30e   : > { %v1279_v28 = vmul.f32 %v1234_v26, %v1055_v27  ;;  %v1280_v31 = vmul.f32 %v1239_v29, %v1056_v30 }
 0x310   : > { %1496 = vmatmul.mubr.f32.gmra.mrb[28].mxu0 %v1265_v48 }
 0x311   : > { %1501 = vmatprep.mubr.f32.mxu0 %v3378_v54  ;;  %v1244_v32 = vpop.permute.xlu0 %1243  ;;  %v1249_v35 = vpop.permute.xlu1 %1248 }
 0x312   : > { %v1281_v34 = vmul.f32 %v1244_v32, %v1057_v33  ;;  %v1282_v37 = vmul.f32 %v1249_v35, %v1058_v36 }
 0x314   : > { %1502 = vmatmul.mubr.f32.gmra.mrb[30].mxu0 %v1266_v52 }
 0x315   : > { %1507 = vmatprep.mubr.f32.mxu0 %v3378_v54 }
 0x318   : > { %1508 = vmatmul.mubr.f32.gmra.mrb[32].mxu0 %v1267_v56 }
 0x319   : > { %1513 = vmatprep.mubr.f32.mxu0 %v3378_v54 }
 0x31c   : > { %1514 = vmatmul.mubr.f32.gmra.mrb[34].mxu0 %v1268_v59 }
 0x31d   : > { %1519 = vmatprep.mubr.f32.mxu0 %v3378_v54 }
 0x320   : > { %1520 = vmatmul.mubr.f32.gmra.mrb[36].mxu0 %v1269_v62 }
 0x321   : > { %1525 = vmatprep.mubr.f32.mxu0 %v3378_v54 }
 0x324   : > { %1526 = vmatmul.mubr.f32.gmra.mrb[38].mxu0 %v1270_v1 }
 0x325   : > { %1531 = vmatprep.mubr.f32.mxu0 %v3378_v54 }
 0x328   : > { %1532 = vmatmul.mubr.f32.gmra.mrb[40].mxu0 %v1271_v4 }
 0x329   : > { %1537 = vmatprep.mubr.f32.mxu0 %v3378_v54 }
 0x32c   : > { %1538 = vmatmul.mubr.f32.gmra.mrb[42].mxu0 %v1272_v7 }
 0x32d   : > { %1543 = vmatprep.mubr.f32.mxu0 %v3378_v54 }
 0x330   : > { %1544 = vmatmul.mubr.f32.gmra.mrb[44].mxu0 %v1273_v10  ;;  %v1975_v10 = vlaneseq }
 0x331   : > { %1549 = vmatprep.mubr.f32.mxu0 %v3378_v54 }
 0x332   : > { %v1976_v15 = vshrl.u32 %v1975_v10, 7 }
 0x334   : > { %1550 = vmatmul.mubr.f32.gmra.mrb[46].mxu0 %v1274_v13 }
 0x335   : > { %1555 = vmatprep.mubr.f32.mxu0 %v3378_v54 }
 0x338   : > { %1556 = vmatmul.mubr.f32.gmra.mrb[48].mxu0 %v1275_v16  ;;  %v1977_v16 = vsub.s32 0, %v1976_v15 }
 0x339   : > { %1561 = vmatprep.mubr.f32.mxu0 %v3378_v54 }
 0x33a   : > { %v4029_v23 = vrot.slane %v1973_v18, %v1977_v16 }
 0x33c   : > { %1562 = vmatmul.mubr.f32.gmra.mrb[50].mxu0 %v1276_v19  ;;  %v1981_v19 = vsub.s32 1, %v1976_v15 }
 0x33d   : > { %1567 = vmatprep.mubr.f32.mxu0 %v3378_v54 }
 0x340   : > { %1568 = vmatmul.mubr.f32.gmra.mrb[52].mxu0 %v1277_v22 }
 0x341   : > { %1573 = vmatprep.mubr.f32.mxu0 %v3378_v54 }
 0x344   : > { %1574 = vmatmul.mubr.f32.gmra.mrb[54].mxu0 %v1278_v25  ;;  %v4031_v25 = vrot.slane %v1973_v18, %v1981_v19 }
 0x345   : > { %1579 = vmatprep.mubr.f32.mxu0 %v3378_v54 }
 0x348   : > { %1580 = vmatmul.mubr.f32.gmra.mrb[56].mxu0 %v1279_v28 }
 0x349   : > { %1585 = vmatprep.mubr.f32.mxu0 %v3378_v54 }
 0x34b   : > { %v1814_v38 = vpop.f32.mrb[0].mxu1 }
 0x34c   : > { %1586 = vmatmul.mubr.f32.gmra.mrb[58].mxu0 %v1280_v31  ;;  %v1816_v39 = vpop.f32.mrb[1].mxu1 }
 0x34d   : > { %1591 = vmatprep.mubr.f32.mxu0 %v3378_v54  ;;  %v1818_v51 = vpop.f32.mrb[2].mxu1 }
 0x34e   : > { %v1820_v40 = vpop.f32.mrb[3].mxu1 }
 0x350   : > { %1592 = vmatmul.mubr.f32.gmra.mrb[60].mxu0 %v1281_v34 }
 0x351   : > { %1597 = vmatprep.mubr.f32.mxu0 %v3378_v54 }
 0x353   : > { %v3946_v41 = vpop.f32.mrb[4].mxu1 }
 0x354   : > { %1598 = vmatmul.mubr.f32.gmra.mrb[62].mxu0 %v1282_v37  ;;  %v3948_v42 = vpop.f32.mrb[5].mxu1 }
 0x355   : > { %v3950_v43 = vpop.f32.mrb[6].mxu1 }
 0x356   : > { %v3952_v44 = vpop.f32.mrb[7].mxu1 }
 0x35b   : > { %v3954_v45 = vpop.f32.mrb[8].mxu1 }
 0x35c   : > { %v3956_v46 = vpop.f32.mrb[9].mxu1 }
 0x35d   : > { %v3958_v47 = vpop.f32.mrb[10].mxu1 }
 0x35e   : > { %v3960_v54 = vpop.f32.mrb[11].mxu1 }
 0x363   : > { %v3962_v48 = vpop.f32.mrb[12].mxu1 }
 0x364   : > { %v3964_v49 = vpop.f32.mrb[13].mxu1 }
 0x365   : > { %v3966_v50 = vpop.f32.mrb[14].mxu1 }
 0x366   : > { %v3968_v52 = vpop.f32.mrb[15].mxu1 }
 0x36b   : > { %v3970_v53 = vpop.f32.mrb[16].mxu1 }
 0x36c   : > { %v3972_v55 = vpop.f32.mrb[17].mxu1 }
 0x36d   : > { %v3974_v56 = vpop.f32.mrb[18].mxu1 }
 0x36e   : > { %v3976_v57 = vpop.f32.mrb[19].mxu1 }
 0x373   : > { %v3978_v58 = vpop.f32.mrb[20].mxu1 }
 0x374   : > { %v3980_v59 = vpop.f32.mrb[21].mxu1 }
 0x375   : > { %v3982_v60 = vpop.f32.mrb[22].mxu1 }
 0x376   : > { %v3984_v61 = vpop.f32.mrb[23].mxu1 }
 0x37b   : > { %v3986_v62 = vpop.f32.mrb[24].mxu1 }
 0x37c   : > { %v3988_v63 = vpop.f32.mrb[25].mxu1 }
 0x37d   : > { %v3990_v0 = vpop.f32.mrb[26].mxu1 }
 0x37e   : > { %v3992_v1 = vpop.f32.mrb[27].mxu1 }
 0x383   : > { %v3994_v2 = vpop.f32.mrb[28].mxu1 }
 0x384   : > { %v3996_v3 = vpop.f32.mrb[29].mxu1 }
 0x385   : > { %v3998_v4 = vpop.f32.mrb[30].mxu1 }
 0x386   : > { %v4000_v5 = vpop.f32.mrb[31].mxu1 }
 0x38b   : > { %v4002_v6 = vpop.f32.mrb[32].mxu1 }
 0x38c   : > { %v4004_v7 = vpop.f32.mrb[33].mxu1 }
 0x38d   : > { %v4006_v8 = vpop.f32.mrb[34].mxu1 }
 0x38e   : > { %v4008_v9 = vpop.f32.mrb[35].mxu1 }
 0x393   : > { %v4010_v11 = vpop.f32.mrb[36].mxu1 }
 0x394   : > { %v4012_v12 = vpop.f32.mrb[37].mxu1 }
 0x395   : > { %v4014_v13 = vpop.f32.mrb[38].mxu1 }
 0x396   : > { %v4016_v14 = vpop.f32.mrb[39].mxu1 }
 0x39b   : > { %v4018_v17 = vpop.f32.mrb[40].mxu1 }
 0x39c   : > { %v4023_v20 = vpop.f32.mrb[41].mxu1 }
 0x39d   : > { %v4025_v21 = vpop.f32.mrb[42].mxu1 }
 0x39e   : > { %v4027_v22 = vpop.f32.mrb[43].mxu1 }
 0x3a3   : > { %v4034_v30 = vpop.f32.mrb[44].mxu1 }
 0x3a4   : > { %v4037_v33 = vpop.f32.mrb[45].mxu1 }
 0x3a5   : > { %v4039_v37 = vpop.f32.mrb[46].mxu1 }
 0x3ab   : > { %v1413_v24 = vpop.f32.mrb[0].mxu0 }
 0x3ac   : > { %v1815_v26 = vadd.f32 %v1814_v38, %v1413_v24  ;;  %v1415_v27 = vpop.f32.mrb[1].mxu0  ;;  %v4041_v38 = vpop.f32.mrb[47].mxu1 }
 0x3ad   : > { %v1817_v28 = vadd.f32 %v1816_v39, %v1415_v27 }
 0x3ae   : > { %v1985_v29 = vadd.f32 %v4029_v23, %v1815_v26 }
 0x3af   : > { %v1986_v31 = vadd.f32 %v4031_v25, %v1817_v28  ;;  %v1419_v32 = vpop.f32.mrb[2].mxu0 }
 0x3b0   : > { %v2049_v34 = vmax.f32 %v1985_v29, 0.0  ;;  %v1819_v35 = vadd.f32 %v1818_v51, %v1419_v32  ;;  %v1421_v36 = vpop.f32.mrb[3].mxu0 }
 0x3b1   : > { %v2050_v10 = vmax.f32 %v1986_v31, 0.0  ;;  %v1821_v15 = vadd.f32 %v1820_v40, %v1421_v36  ;;  %v4049_v40 = vpop.f32.mrb[48].mxu1 }
 0x3b2   : > { %v1987_v39 = vadd.f32 %v4029_v23, %v1819_v35  ;;  %v4052_v35 = vpop.f32.mrb[49].mxu1 }
 0x3b3   : > { %v2635_v16 = vpack.c.bf16 %v2050_v10, %v2049_v34  ;;  %v1988_v18 = vadd.f32 %v4031_v25, %v1821_v15  ;;  %v1425_v19 = vpop.f32.mrb[4].mxu0  ;;  %v4055_v15 = vpop.f32.mrb[50].mxu1 }
 0x3b4   : > { %v2051_v24 = vmax.f32 %v1987_v39, 0.0  ;;  %v1825_v26 = vadd.f32 %v3946_v41, %v1425_v19  ;;  %v1427_v27 = vpop.f32.mrb[5].mxu0 }
 0x3b5   : > { %2305 = vst [vmem:[%s3810_s11] sm:$0xff] %v2635_v16  ;;  %v2052_v51 = vmax.f32 %v1988_v18, 0.0  ;;  %v1827_v28 = vadd.f32 %v3948_v42, %v1427_v27  ;;  %v4059_v16 = vpop.f32.mrb[51].mxu1 }
 0x3b6   : > { %v1989_v29 = vadd.f32 %v4029_v23, %v1825_v26 }
 0x3b7   : > { %v2636_v31 = vpack.c.bf16 %v2052_v51, %v2051_v24  ;;  %v1990_v32 = vadd.f32 %v4031_v25, %v1827_v28  ;;  %v1431_v34 = vpop.f32.mrb[6].mxu0 }
 0x3b8   : > { %v2053_v36 = vmax.f32 %v1989_v29, 0.0  ;;  %v1829_v10 = vadd.f32 %v3950_v43, %v1431_v34  ;;  %v1433_v41 = vpop.f32.mrb[7].mxu0 }
 0x3b9   : > { %2306 = vst [vmem:[%s3810_s11 + $0x8] sm:$0xff] %v2636_v31  ;;  %v2054_v39 = vmax.f32 %v1990_v32, 0.0  ;;  %v1831_v42 = vadd.f32 %v3952_v44, %v1433_v41  ;;  %v4067_v44 = vpop.f32.mrb[52].mxu1 }
 0x3ba   : > { %v1991_v18 = vadd.f32 %v4029_v23, %v1829_v10  ;;  %v4070_v10 = vpop.f32.mrb[53].mxu1 }
 0x3bb   : > { %v2637_v19 = vpack.c.bf16 %v2054_v39, %v2053_v36  ;;  %v1992_v24 = vadd.f32 %v4031_v25, %v1831_v42  ;;  %v1437_v26 = vpop.f32.mrb[8].mxu0  ;;  %v4073_v42 = vpop.f32.mrb[54].mxu1 }
 0x3bc   : > { %v2055_v27 = vmax.f32 %v1991_v18, 0.0  ;;  %v1835_v51 = vadd.f32 %v3954_v45, %v1437_v26  ;;  %v1439_v43 = vpop.f32.mrb[9].mxu0 }
 0x3bd   : > { %2307 = vst [vmem:[%s3810_s11 + $0x10] sm:$0xff] %v2637_v19  ;;  %v2056_v28 = vmax.f32 %v1992_v24, 0.0  ;;  %v1837_v29 = vadd.f32 %v3956_v46, %v1439_v43  ;;  %v4077_v19 = vpop.f32.mrb[55].mxu1 }
 0x3be   : > { %v1993_v31 = vadd.f32 %v4029_v23, %v1835_v51 }
 0x3bf   : > { %v2638_v32 = vpack.c.bf16 %v2056_v28, %v2055_v27  ;;  %v1994_v34 = vadd.f32 %v4031_v25, %v1837_v29  ;;  %v1443_v36 = vpop.f32.mrb[10].mxu0 }
 0x3c0   : > { %v2057_v41 = vmax.f32 %v1993_v31, 0.0  ;;  %v1839_v39 = vadd.f32 %v3958_v47, %v1443_v36  ;;  %v1445_v45 = vpop.f32.mrb[11].mxu0 }
 0x3c1   : > { %2308 = vst [vmem:[%s3810_s11 + $0x18] sm:$0xff] %v2638_v32  ;;  %v2058_v18 = vmax.f32 %v1994_v34, 0.0  ;;  %v1841_v46 = vadd.f32 %v3960_v54, %v1445_v45  ;;  %v4085_v54 = vpop.f32.mrb[56].mxu1 }
 0x3c2   : > { %v1995_v24 = vadd.f32 %v4029_v23, %v1839_v39  ;;  %v4088_v39 = vpop.f32.mrb[57].mxu1 }
 0x3c3   : > { %v2639_v26 = vpack.c.bf16 %v2058_v18, %v2057_v41  ;;  %v1996_v27 = vadd.f32 %v4031_v25, %v1841_v46  ;;  %v1449_v51 = vpop.f32.mrb[12].mxu0  ;;  %v4091_v46 = vpop.f32.mrb[58].mxu1 }
 0x3c4   : > { %v2059_v43 = vmax.f32 %v1995_v24, 0.0  ;;  %v1845_v28 = vadd.f32 %v3962_v48, %v1449_v51  ;;  %v1451_v47 = vpop.f32.mrb[13].mxu0 }
 0x3c5   : > { %2309 = vst [vmem:[%s3810_s11 + $0x20] sm:$0xff] %v2639_v26  ;;  %v2060_v29 = vmax.f32 %v1996_v27, 0.0  ;;  %v1847_v31 = vadd.f32 %v3964_v49, %v1451_v47  ;;  %v4095_v26 = vpop.f32.mrb[59].mxu1 }
 0x3c6   : > { %v1997_v32 = vadd.f32 %v4029_v23, %v1845_v28 }
 0x3c7   : > { %v2640_v34 = vpack.c.bf16 %v2060_v29, %v2059_v43  ;;  %v1998_v36 = vadd.f32 %v4031_v25, %v1847_v31  ;;  %v1455_v41 = vpop.f32.mrb[14].mxu0 }
 0x3c8   : > { %v2061_v45 = vmax.f32 %v1997_v32, 0.0  ;;  %v1849_v18 = vadd.f32 %v3966_v50, %v1455_v41  ;;  %v1457_v48 = vpop.f32.mrb[15].mxu0 }
 0x3c9   : > { %2310 = vst [vmem:[%s3810_s11 + $0x28] sm:$0xff] %v2640_v34  ;;  %v2062_v24 = vmax.f32 %v1998_v36, 0.0  ;;  %v1851_v49 = vadd.f32 %v3968_v52, %v1457_v48  ;;  %v4103_v52 = vpop.f32.mrb[60].mxu1 }
 0x3ca   : > { %v1999_v27 = vadd.f32 %v4029_v23, %v1849_v18  ;;  %v4106_v18 = vpop.f32.mrb[61].mxu1 }
 0x3cb   : > { %v2641_v51 = vpack.c.bf16 %v2062_v24, %v2061_v45  ;;  %v2000_v43 = vadd.f32 %v4031_v25, %v1851_v49  ;;  %v1461_v28 = vpop.f32.mrb[16].mxu0  ;;  %v4109_v49 = vpop.f32.mrb[62].mxu1 }
 0x3cc   : > { %v2063_v47 = vmax.f32 %v1999_v27, 0.0  ;;  %v1855_v29 = vadd.f32 %v3970_v53, %v1461_v28  ;;  %v1463_v50 = vpop.f32.mrb[17].mxu0 }
 0x3cd   : > { %2311 = vst [vmem:[%s3810_s11 + $0x30] sm:$0xff] %v2641_v51  ;;  %v2064_v31 = vmax.f32 %v2000_v43, 0.0  ;;  %v1857_v32 = vadd.f32 %v3972_v55, %v1463_v50  ;;  %v4113_v51 = vpop.f32.mrb[63].mxu1 }
 0x3ce   : > { %v2001_v34 = vadd.f32 %v4029_v23, %v1855_v29 }
 0x3cf   : > { %v2642_v36 = vpack.c.bf16 %v2064_v31, %v2063_v47  ;;  %v2002_v41 = vadd.f32 %v4031_v25, %v1857_v32  ;;  %v1467_v45 = vpop.f32.mrb[18].mxu0 }
 0x3d0   : > { %v2065_v48 = vmax.f32 %v2001_v34, 0.0  ;;  %v1859_v24 = vadd.f32 %v3974_v56, %v1467_v45  ;;  %v1469_v53 = vpop.f32.mrb[19].mxu0 }
 0x3d1   : > { %2312 = vst [vmem:[%s3810_s11 + $0x38] sm:$0xff] %v2642_v36  ;;  %v2066_v27 = vmax.f32 %v2002_v41, 0.0  ;;  %v1861_v55 = vadd.f32 %v3976_v57, %v1469_v53 }
 0x3d2   : > { %v2003_v43 = vadd.f32 %v4029_v23, %v1859_v24 }
 0x3d3   : > { %v2643_v28 = vpack.c.bf16 %v2066_v27, %v2065_v48  ;;  %v2004_v47 = vadd.f32 %v4031_v25, %v1861_v55  ;;  %v1473_v29 = vpop.f32.mrb[20].mxu0 }
 0x3d4   : > { %v2067_v50 = vmax.f32 %v2003_v43, 0.0  ;;  %v1865_v31 = vadd.f32 %v3978_v58, %v1473_v29  ;;  %v1475_v56 = vpop.f32.mrb[21].mxu0 }
 0x3d5   : > { %2313 = vst [vmem:[%s3810_s11 + $0x40] sm:$0xff] %v2643_v28  ;;  %v2068_v32 = vmax.f32 %v2004_v47, 0.0  ;;  %v1867_v34 = vadd.f32 %v3980_v59, %v1475_v56 }
 0x3d6   : > { %v2005_v36 = vadd.f32 %v4029_v23, %v1865_v31 }
 0x3d7   : > { %v2644_v57 = vpack.c.bf16 %v2068_v32, %v2067_v50  ;;  %v2006_v41 = vadd.f32 %v4031_v25, %v1867_v34  ;;  %v1479_v45 = vpop.f32.mrb[22].mxu0 }
 0x3d8   : > { %v2069_v48 = vmax.f32 %v2005_v36, 0.0  ;;  %v1869_v24 = vadd.f32 %v3982_v60, %v1479_v45  ;;  %v1481_v53 = vpop.f32.mrb[23].mxu0 }
 0x3d9   : > { %2314 = vst [vmem:[%s3810_s11 + $0x48] sm:$0xff] %v2644_v57  ;;  %v2070_v27 = vmax.f32 %v2006_v41, 0.0  ;;  %v1871_v58 = vadd.f32 %v3984_v61, %v1481_v53 }
 0x3da   : > { %v2007_v55 = vadd.f32 %v4029_v23, %v1869_v24 }
 0x3db   : > { %v2645_v43 = vpack.c.bf16 %v2070_v27, %v2069_v48  ;;  %v2008_v59 = vadd.f32 %v4031_v25, %v1871_v58  ;;  %v1485_v28 = vpop.f32.mrb[24].mxu0 }
 0x3dc   : > { %v2071_v47 = vmax.f32 %v2007_v55, 0.0  ;;  %v1875_v29 = vadd.f32 %v3986_v62, %v1485_v28  ;;  %v1487_v50 = vpop.f32.mrb[25].mxu0 }
 0x3dd   : > { %2315 = vst [vmem:[%s3810_s11 + $0x50] sm:$0xff] %v2645_v43  ;;  %v2072_v31 = vmax.f32 %v2008_v59, 0.0  ;;  %v1877_v60 = vadd.f32 %v3988_v63, %v1487_v50 }
 0x3de   : > { %v2009_v56 = vadd.f32 %v4029_v23, %v1875_v29 }
 0x3df   : > { %v2646_v32 = vpack.c.bf16 %v2072_v31, %v2071_v47  ;;  %v2010_v61 = vadd.f32 %v4031_v25, %v1877_v60  ;;  %v1491_v34 = vpop.f32.mrb[26].mxu0 }
 0x3e0   : > { %v2073_v36 = vmax.f32 %v2009_v56, 0.0  ;;  %v1879_v57 = vadd.f32 %v3990_v0, %v1491_v34  ;;  %v1493_v41 = vpop.f32.mrb[27].mxu0 }
 0x3e1   : > { %2316 = vst [vmem:[%s3810_s11 + $0x58] sm:$0xff] %v2646_v32  ;;  %v2074_v45 = vmax.f32 %v2010_v61, 0.0  ;;  %v1881_v62 = vadd.f32 %v3992_v1, %v1493_v41 }
 0x3e2   : > { %v2011_v48 = vadd.f32 %v4029_v23, %v1879_v57 }
 0x3e3   : > { %v2647_v24 = vpack.c.bf16 %v2074_v45, %v2073_v36  ;;  %v2012_v63 = vadd.f32 %v4031_v25, %v1881_v62  ;;  %v1497_v53 = vpop.f32.mrb[28].mxu0 }
 0x3e4   : > { %v2075_v27 = vmax.f32 %v2011_v48, 0.0  ;;  %v1885_v58 = vadd.f32 %v3994_v2, %v1497_v53  ;;  %v1499_v55 = vpop.f32.mrb[29].mxu0 }
 0x3e5   : > { %2317 = vst [vmem:[%s3810_s11 + $0x60] sm:$0xff] %v2647_v24  ;;  %v2076_v43 = vmax.f32 %v2012_v63, 0.0  ;;  %v1887_v0 = vadd.f32 %v3996_v3, %v1499_v55 }
 0x3e6   : > { %v2013_v59 = vadd.f32 %v4029_v23, %v1885_v58 }
 0x3e7   : > { %v2648_v28 = vpack.c.bf16 %v2076_v43, %v2075_v27  ;;  %v2014_v1 = vadd.f32 %v4031_v25, %v1887_v0  ;;  %v1503_v47 = vpop.f32.mrb[30].mxu0 }
 0x3e8   : > { %v2077_v29 = vmax.f32 %v2013_v59, 0.0  ;;  %v1889_v50 = vadd.f32 %v3998_v4, %v1503_v47  ;;  %v1505_v31 = vpop.f32.mrb[31].mxu0 }
 0x3e9   : > { %2318 = vst [vmem:[%s3810_s11 + $0x68] sm:$0xff] %v2648_v28  ;;  %v2078_v60 = vmax.f32 %v2014_v1, 0.0  ;;  %v1891_v2 = vadd.f32 %v4000_v5, %v1505_v31 }
 0x3ea   : > { %v2015_v56 = vadd.f32 %v4029_v23, %v1889_v50 }
 0x3eb   : > { %v2649_v32 = vpack.c.bf16 %v2078_v60, %v2077_v29  ;;  %v2016_v3 = vadd.f32 %v4031_v25, %v1891_v2  ;;  %v1509_v61 = vpop.f32.mrb[32].mxu0 }
 0x3ec   : > { %v2079_v34 = vmax.f32 %v2015_v56, 0.0  ;;  %v1895_v36 = vadd.f32 %v4002_v6, %v1509_v61  ;;  %v1511_v57 = vpop.f32.mrb[33].mxu0 }
 0x3ed   : > { %2319 = vst [vmem:[%s3810_s11 + $0x70] sm:$0xff] %v2649_v32  ;;  %v2080_v41 = vmax.f32 %v2016_v3, 0.0  ;;  %v1897_v4 = vadd.f32 %v4004_v7, %v1511_v57 }
 0x3ee   : > { %v2017_v45 = vadd.f32 %v4029_v23, %v1895_v36 }
 0x3ef   : > { %v2650_v62 = vpack.c.bf16 %v2080_v41, %v2079_v34  ;;  %v2018_v5 = vadd.f32 %v4031_v25, %v1897_v4  ;;  %v1515_v48 = vpop.f32.mrb[34].mxu0 }
 0x3f0   : > { %v2081_v24 = vmax.f32 %v2017_v45, 0.0  ;;  %v1899_v63 = vadd.f32 %v4006_v8, %v1515_v48  ;;  %v1517_v53 = vpop.f32.mrb[35].mxu0 }
 0x3f1   : > { %2320 = vst [vmem:[%s3810_s11 + $0x78] sm:$0xff] %v2650_v62  ;;  %v2082_v27 = vmax.f32 %v2018_v5, 0.0  ;;  %v1901_v6 = vadd.f32 %v4008_v9, %v1517_v53 }
 0x3f2   : > { %v2019_v58 = vadd.f32 %v4029_v23, %v1899_v63 }
 0x3f3   : > { %v2651_v55 = vpack.c.bf16 %v2082_v27, %v2081_v24  ;;  %v2020_v7 = vadd.f32 %v4031_v25, %v1901_v6  ;;  %v1521_v43 = vpop.f32.mrb[36].mxu0 }
 0x3f4   : > { %v2083_v0 = vmax.f32 %v2019_v58, 0.0  ;;  %v1905_v59 = vadd.f32 %v4010_v11, %v1521_v43  ;;  %v1523_v28 = vpop.f32.mrb[37].mxu0 }
 0x3f5   : > { %2321 = vst [vmem:[%s3810_s11 + $0x80] sm:$0xff] %v2651_v55  ;;  %v2084_v1 = vmax.f32 %v2020_v7, 0.0  ;;  %v1907_v8 = vadd.f32 %v4012_v12, %v1523_v28 }
 0x3f6   : > { %v2021_v47 = vadd.f32 %v4029_v23, %v1905_v59 }
 0x3f7   : > { %v2652_v29 = vpack.c.bf16 %v2084_v1, %v2083_v0  ;;  %v2022_v9 = vadd.f32 %v4031_v25, %v1907_v8  ;;  %v1527_v50 = vpop.f32.mrb[38].mxu0 }
 0x3f8   : > { %v2085_v31 = vmax.f32 %v2021_v47, 0.0  ;;  %v1909_v60 = vadd.f32 %v4014_v13, %v1527_v50  ;;  %v1529_v2 = vpop.f32.mrb[39].mxu0 }
 0x3f9   : > { %2322 = vst [vmem:[%s3810_s11 + $0x88] sm:$0xff] %v2652_v29  ;;  %v2086_v56 = vmax.f32 %v2022_v9, 0.0  ;;  %v1911_v11 = vadd.f32 %v4016_v14, %v1529_v2 }
 0x3fa   : > { %v2023_v32 = vadd.f32 %v4029_v23, %v1909_v60 }
 0x3fb   : > { %v2653_v3 = vpack.c.bf16 %v2086_v56, %v2085_v31  ;;  %v2024_v12 = vadd.f32 %v4031_v25, %v1911_v11  ;;  %v1533_v61 = vpop.f32.mrb[40].mxu0 }
 0x3fc   : > { %v2087_v34 = vmax.f32 %v2023_v32, 0.0  ;;  %v1915_v36 = vadd.f32 %v4018_v17, %v1533_v61  ;;  %v1535_v57 = vpop.f32.mrb[41].mxu0 }
 0x3fd   : > { %2323 = vst [vmem:[%s3810_s11 + $0x90] sm:$0xff] %v2653_v3  ;;  %v2088_v41 = vmax.f32 %v2024_v12, 0.0  ;;  %v1917_v13 = vadd.f32 %v4023_v20, %v1535_v57 }
 0x3fe   : > { %v2025_v4 = vadd.f32 %v4029_v23, %v1915_v36 }
 0x3ff   : > { %v2654_v45 = vpack.c.bf16 %v2088_v41, %v2087_v34  ;;  %v2026_v14 = vadd.f32 %v4031_v25, %v1917_v13  ;;  %v1539_v62 = vpop.f32.mrb[42].mxu0 }
 0x400   : > { %v2089_v5 = vmax.f32 %v2025_v4, 0.0  ;;  %v1919_v48 = vadd.f32 %v4025_v21, %v1539_v62  ;;  %v1541_v24 = vpop.f32.mrb[43].mxu0 }
 0x401   : > { %2324 = vst [vmem:[%s3810_s11 + $0x98] sm:$0xff] %v2654_v45  ;;  %v2090_v63 = vmax.f32 %v2026_v14, 0.0  ;;  %v1921_v17 = vadd.f32 %v4027_v22, %v1541_v24 }
 0x402   : > { %v2027_v53 = vadd.f32 %v4029_v23, %v1919_v48 }
 0x403   : > { %v2655_v27 = vpack.c.bf16 %v2090_v63, %v2089_v5  ;;  %v2028_v20 = vadd.f32 %v4031_v25, %v1921_v17  ;;  %v1545_v6 = vpop.f32.mrb[44].mxu0 }
 0x404   : > { %v2091_v58 = vmax.f32 %v2027_v53, 0.0  ;;  %v1925_v55 = vadd.f32 %v4034_v30, %v1545_v6  ;;  %v1547_v7 = vpop.f32.mrb[45].mxu0 }
 0x405   : > { %2325 = vst [vmem:[%s3810_s11 + $0xa0] sm:$0xff] %v2655_v27  ;;  %v2092_v43 = vmax.f32 %v2028_v20, 0.0  ;;  %v1927_v21 = vadd.f32 %v4037_v33, %v1547_v7 }
 0x406   : > { %v2029_v0 = vadd.f32 %v4029_v23, %v1925_v55 }
 0x407   : > { %v2656_v59 = vpack.c.bf16 %v2092_v43, %v2091_v58  ;;  %v2030_v22 = vadd.f32 %v4031_v25, %v1927_v21  ;;  %v1551_v28 = vpop.f32.mrb[46].mxu0 }
 0x408   : > { %v2093_v1 = vmax.f32 %v2029_v0, 0.0  ;;  %v1929_v8 = vadd.f32 %v4039_v37, %v1551_v28  ;;  %v1553_v47 = vpop.f32.mrb[47].mxu0 }
 0x409   : > { %2326 = vst [vmem:[%s3810_s11 + $0xa8] sm:$0xff] %v2656_v59  ;;  %v2094_v29 = vmax.f32 %v2030_v22, 0.0  ;;  %v1931_v30 = vadd.f32 %v4041_v38, %v1553_v47 }
 0x40a   : > { %v2031_v9 = vadd.f32 %v4029_v23, %v1929_v8 }
 0x40b   : > { %v2657_v50 = vpack.c.bf16 %v2094_v29, %v2093_v1  ;;  %v2032_v33 = vadd.f32 %v4031_v25, %v1931_v30  ;;  %v1557_v31 = vpop.f32.mrb[48].mxu0 }
 0x40c   : > { %v2095_v60 = vmax.f32 %v2031_v9, 0.0  ;;  %v1935_v2 = vadd.f32 %v4049_v40, %v1557_v31  ;;  %v1559_v56 = vpop.f32.mrb[49].mxu0 }
 0x40d   : > { %2327 = vst [vmem:[%s3810_s11 + $0xb0] sm:$0xff] %v2657_v50  ;;  %v2096_v11 = vmax.f32 %v2032_v33, 0.0  ;;  %v1937_v37 = vadd.f32 %v4052_v35, %v1559_v56 }
 0x40e   : > { %v2033_v32 = vadd.f32 %v4029_v23, %v1935_v2 }
 0x40f   : > { %v2658_v3 = vpack.c.bf16 %v2096_v11, %v2095_v60  ;;  %v2034_v38 = vadd.f32 %v4031_v25, %v1937_v37  ;;  %v1563_v12 = vpop.f32.mrb[50].mxu0 }
 0x410   : > { %v2097_v61 = vmax.f32 %v2033_v32, 0.0  ;;  %v1939_v34 = vadd.f32 %v4055_v15, %v1563_v12  ;;  %v1565_v36 = vpop.f32.mrb[51].mxu0 }
 0x411   : > { %2328 = vst [vmem:[%s3810_s11 + $0xb8] sm:$0xff] %v2658_v3  ;;  %v2098_v57 = vmax.f32 %v2034_v38, 0.0  ;;  %v1941_v40 = vadd.f32 %v4059_v16, %v1565_v36 }
 0x412   : > { %v2035_v41 = vadd.f32 %v4029_v23, %v1939_v34 }
 0x413   : > { %v2659_v13 = vpack.c.bf16 %v2098_v57, %v2097_v61  ;;  %v2036_v35 = vadd.f32 %v4031_v25, %v1941_v40  ;;  %v1569_v4 = vpop.f32.mrb[52].mxu0 }
 0x414   : > { %v2099_v45 = vmax.f32 %v2035_v41, 0.0  ;;  %v1945_v14 = vadd.f32 %v4067_v44, %v1569_v4  ;;  %v1571_v62 = vpop.f32.mrb[53].mxu0 }
 0x415   : > { %2329 = vst [vmem:[%s3810_s11 + $0xc0] sm:$0xff] %v2659_v13  ;;  %v2100_v5 = vmax.f32 %v2036_v35, 0.0  ;;  %v1947_v15 = vadd.f32 %v4070_v10, %v1571_v62 }
 0x416   : > { %v2037_v48 = vadd.f32 %v4029_v23, %v1945_v14 }
 0x417   : > { %v2660_v24 = vpack.c.bf16 %v2100_v5, %v2099_v45  ;;  %v2038_v16 = vadd.f32 %v4031_v25, %v1947_v15  ;;  %v1575_v63 = vpop.f32.mrb[54].mxu0 }
 0x418   : > { %v2101_v17 = vmax.f32 %v2037_v48, 0.0  ;;  %v1949_v53 = vadd.f32 %v4073_v42, %v1575_v63  ;;  %v1577_v27 = vpop.f32.mrb[55].mxu0 }
 0x419   : > { %2330 = vst [vmem:[%s3810_s11 + $0xc8] sm:$0xff] %v2660_v24  ;;  %v2102_v20 = vmax.f32 %v2038_v16, 0.0  ;;  %v1951_v44 = vadd.f32 %v4077_v19, %v1577_v27 }
 0x41a   : > { %v2039_v6 = vadd.f32 %v4029_v23, %v1949_v53 }
 0x41b   : > { %v2661_v58 = vpack.c.bf16 %v2102_v20, %v2101_v17  ;;  %v2040_v10 = vadd.f32 %v4031_v25, %v1951_v44  ;;  %v1581_v55 = vpop.f32.mrb[56].mxu0 }
 0x41c   : > { %v2103_v7 = vmax.f32 %v2039_v6, 0.0  ;;  %v1955_v43 = vadd.f32 %v4085_v54, %v1581_v55  ;;  %v1583_v21 = vpop.f32.mrb[57].mxu0 }
 0x41d   : > { %2331 = vst [vmem:[%s3810_s11 + $0xd0] sm:$0xff] %v2661_v58  ;;  %v2104_v0 = vmax.f32 %v2040_v10, 0.0  ;;  %v1957_v42 = vadd.f32 %v4088_v39, %v1583_v21 }
 0x41e   : > { %v2041_v59 = vadd.f32 %v4029_v23, %v1955_v43 }
 0x41f   : > { %v2662_v22 = vpack.c.bf16 %v2104_v0, %v2103_v7  ;;  %v2042_v19 = vadd.f32 %v4031_v25, %v1957_v42  ;;  %v1587_v28 = vpop.f32.mrb[58].mxu0 }
 0x420   : > { %v2105_v1 = vmax.f32 %v2041_v59, 0.0  ;;  %v1959_v8 = vadd.f32 %v4091_v46, %v1587_v28  ;;  %v1589_v47 = vpop.f32.mrb[59].mxu0 }
 0x421   : > { %2332 = vst [vmem:[%s3810_s11 + $0xd8] sm:$0xff] %v2662_v22  ;;  %v2106_v29 = vmax.f32 %v2042_v19, 0.0  ;;  %v1961_v54 = vadd.f32 %v4095_v26, %v1589_v47 }
 0x422   : > { %v2043_v30 = vadd.f32 %v4029_v23, %v1959_v8 }
 0x423   : > { %v2663_v9 = vpack.c.bf16 %v2106_v29, %v2105_v1  ;;  %v2044_v39 = vadd.f32 %v4031_v25, %v1961_v54  ;;  %v1593_v50 = vpop.f32.mrb[60].mxu0 }
 0x424   : > { %v2107_v33 = vmax.f32 %v2043_v30, 0.0  ;;  %v1965_v31 = vadd.f32 %v4103_v52, %v1593_v50  ;;  %v1595_v60 = vpop.f32.mrb[61].mxu0 }
 0x425   : > { %2333 = vst [vmem:[%s3810_s11 + $0xe0] sm:$0xff] %v2663_v9  ;;  %v2108_v2 = vmax.f32 %v2044_v39, 0.0  ;;  %v1967_v46 = vadd.f32 %v4106_v18, %v1595_v60 }
 0x426   : > { %v2045_v56 = vadd.f32 %v4029_v23, %v1965_v31 }
 0x427   : > { %v2664_v11 = vpack.c.bf16 %v2108_v2, %v2107_v33  ;;  %v2046_v26 = vadd.f32 %v4031_v25, %v1967_v46  ;;  %v1599_v37 = vpop.f32.mrb[62].mxu0 }
 0x428   : > { %v2109_v32 = vmax.f32 %v2045_v56, 0.0  ;;  %v1969_v3 = vadd.f32 %v4109_v49, %v1599_v37  ;;  %v1601_v38 = vpop.f32.mrb[63].mxu0 }
 0x429   : > { %2334 = vst [vmem:[%s3810_s11 + $0xe8] sm:$0xff] %v2664_v11  ;;  %v2110_v12 = vmax.f32 %v2046_v26, 0.0  ;;  %v1971_v52 = vadd.f32 %v4113_v51, %v1601_v38 }
 0x42a   : > { %v2047_v61 = vadd.f32 %v4029_v23, %v1969_v3 }
 0x42b   : > { %v2665_v34 = vpack.c.bf16 %v2110_v12, %v2109_v32  ;;  %v2048_v18 = vadd.f32 %v4031_v25, %v1971_v52 }
 0x42c   : > { %v2111_v36 = vmax.f32 %v2047_v61, 0.0 }
 0x42d   : > { %2335 = vst [vmem:[%s3810_s11 + $0xf0] sm:$0xff] %v2665_v34  ;;  %v2112_v57 = vmax.f32 %v2048_v18, 0.0 }
 0x42f   : > { %v2666_v40 = vpack.c.bf16 %v2112_v57, %v2111_v36 }
 0x431   : > { %2336 = vst [vmem:[%s3810_s11 + $0xf8] sm:$0xff] %v2666_v40 }
 0x432 PF: > { %s4395_s27 = sld [smem:[#allocation27_spill]]  ;;  %s4396_s0 = sld [smem:[#allocation36_spill]] }
 0x433   : > { %s4397_s17 = sld [smem:[#allocation41_spill]]  ;;  %s2352_s5 = sshll.u32 %s3810_s11, 4  ;;  %s4236_s5 = int_to_ptr.vmem [resolvable:$true] %s2352_s5 }
 0x434   : > { %s2338_s16 = scalar_lea.sflag [#allocation9], %s3786_s13  ;;  %s3212_s14 = scalar_lea.vmem %s4236_s5, 4096 }
 0x435   : > { %p3213_p6 = scmp.ne.s32.totalorder %s4236_s5, %s3212_s14  ;;  %s3379_s12 = smov [#allocation15]  }
 0x436   : > { %s3216_s23 = sshll.u32 %s3379_s12, 4  ;;  %s3217_s23 = int_to_ptr.vmem [resolvable:$false] %s3216_s23 }
 0x437   : > { %s3218_s30 = scalar_lea.vmem %s3217_s23, 8192  ;;  %p3219_p3 = scmp.lt.s32.totalorder %s4236_s5, %s3217_s23 }
 0x438   : > { %s2668_s10 = sshll.u32 %s4395_s27, 12  ;;  %p4398_p9 = scmp.ne.s32.totalorder %s4396_s0, 0 }
 0x439   : > { %s4233_s1 = scalar_lea.hbm %s4397_s17, %s2668_s10  ;;  %p3220_p10 = scmp.lt.s32.totalorder %s3218_s30, %s3212_s14 }
 0x43a   : > { %p3214_p1 = pnand %p3213_p6, %p4398_p9 }
 0x43b   : > { %p3221_p5 = por %p3220_p10, %p3219_p3 }
 0x43c   : > { %p3215_p12 = pneg %p3214_p1 }
 0x43e   : > { %p3222_p11 = pnand %p3221_p5, %p3215_p12 }
 0x440   : > { %3225 = shalt.err (!%p3222_p11)
}
 0x441   : > { %s3226_s11 = scalar_lea.hbm %s4233_s1, 4096  ;;  %s3230_s2 = scalar_lea.hbm %s4397_s17, 8192 }
 0x442   : > { %p3227_p7 = scmp.ne.s32.totalorder %s4233_s1, %s3226_s11  ;;  %p3231_p13 = scmp.lt.u32.totalorder %s4233_s1, %s4397_s17 }
 0x443   : > { %p3232_p2 = scmp.lt.u32.totalorder %s3230_s2, %s3226_s11  ;;  %p3234_p6 = scmp.lt.u32.totalorder %s3226_s11, %s4233_s1 }
 0x444   : > { %p3228_p4 = pnand %p3227_p7, %p4398_p9 }
 0x445   : > { %p3233_p8 = por %p3232_p2, %p3231_p13 }
 0x446   : > { %p3229_p0 = pneg %p3228_p4 }
 0x447   : > { %p3235_p1 = por %p3234_p6, %p3233_p8 }
 0x449   : > { %p3236_p12 = pnand %p3235_p1, %p3229_p0 }
 0x44b   : > { %3239 = shalt.err (!%p3236_p12)
}
 0x44c   : > { %s3380_s15 = smov 128   ;;  %s3381_s27 = smov 8  }
 0x44d   : > { %2859 = dma.vmem_to_hbm [thread:$0]  (%p4398_p9), %s4236_s5, 4096, %s4233_s1, %s2338_s16, %s3380_s15, %s3380_s15, %s3381_s27  }
 0x44e PF: > { %s4399_s10 = sld [smem:[#allocation23_spill]]  ;;  %s4400_s9 = sld [smem:[#allocation37_spill]] }
 0x44f   : > { %p2876_p3 = scmp.ge.s32.totalorder %s3364_s29, 2 }
 0x454   : > { %s2367_s8 = sand.u32 1, %s4399_s10   ;;  %p4401_p10 = scmp.ne.s32.totalorder %s4400_s9, 0 }
 0x455   : > { %s2368_s14 = scalar_lea.sflag [#allocation9], %s2367_s8 }
 0x456   : > { %p2869_p5 = pnand %p2876_p3, %p4401_p10 }
 0x458   : > { %3311 = dma.done.wait (!%p2869_p5), %s2368_s14, 4096  }
 0x459   : > { %3313 = vsyncadd (!%p2869_p5), %s2368_s14, 4294963200  ;;  %s39_s29 = sadd.s32 1, %s3364_s29   ;;  %s4403_s13 = sld [smem:[#allocation32_spill]] }
 0x45a   : > { %p4267_p11 = scmp.ge.s32.totalorder %s39_s29, 6   ;;  %s4404_s20 = sld [smem:[#allocation24_spill]] }
 0x45b   : > { %s4405_s0 = sld [smem:[#allocation34_spill]]  ;;  %s4406_s5 = sld [smem:[#allocation35_spill]] }
 0x45c   : > { %s4407_s25 = sld [smem:[#allocation28_spill]]  ;;  %s4408_s27 = sld [smem:[#allocation29_spill]] }
 0x45d   : > { %s4409_s16 = sld [smem:[#allocation30_spill]]  ;;  %s4410_s1 = smov %s3320_s18 }
 0x45e   : > { %s4411_s18 = smov %s3324_s19  ;;  %s4413_s21 = smov %s3336_s22 }
 0x45f   : > { %s4412_s19 = smov %s4403_s13  ;;  %s4415_s23 = smov %s3344_s24 }
 0x460   : > { %s4417_s26 = smov %s3360_s28  ;;  %38 = sbr.rel (!%p4267_p11) target bundleno = 40 (0x28), region = 160 }
 0x461   : > { %s4414_s22 = smov %s4405_s0  ;;  %s4416_s24 = smov %s4406_s5 }
 0x463   : > { %s4418_s28 = smov %s4409_s16 }
 0x467   :  { %2373 = vsyncpa [#allocation8], 1 }
 0x468   :  { %2375 = vsyncpa [#allocation8 + $0x1], 1 }
 0x469   :  { %2376 = vsyncpa [#allocation11], 1 }
 0x46a   :  { %2378 = vsyncpa [#allocation11 + $0x1], 1 }
 0x46b   :  { %2379 = vsyncpa [#allocation14], 1 }
 0x46c   :  { %2380 = vsyncpa [#allocation9], 1 }
 0x46d   :  { %2382 = vsyncpa [#allocation9 + $0x1], 1 }

</bundles_post_ra>
